<compile_context>
chip_gen: v7x
topology: tpu7x:2x2x1
jax: 0.10.0
libtpu: 0.0.40
codegen_flags: <defaults>
</compile_context>

<pallas_src>
import functools

import jax
import jax.numpy as jnp
import numpy as np
from jax import lax
from jax.experimental import pallas as pl
from jax.experimental.pallas import tpu as pltpu

_EPS = 1e-5  # torch.nn.BatchNorm2d default

# HIGHEST keeps enough accuracy for the 1e-4 self-check; the conv matmuls are
# tiny (K = 9*Cg) so the extra MXU passes are negligible here.
# TODO(synk): for production sizes drop to DEFAULT / bf16 inputs (3-6x less MXU
# work) and relax the tolerance accordingly (perf-review item).
_PRECISION = lax.Precision.HIGHEST


def _round_up(v, m):
    return (v + m - 1) // m * m


def _upsample2x_bilinear_nchw(x):
    """nn.Upsample(scale_factor=2, mode='bilinear', align_corners=False) — JAX glue."""
    # TODO(synk): gather-based interpolation kept in plain JAX (fused by XLA under
    # the same jit as the kernel); the conv/BN/ReLU hot path is in Pallas.
    n, c, h, w = x.shape

    def src_idx(size):
        out = jnp.arange(2 * size, dtype=jnp.float32)
        src = jnp.clip((out + 0.5) / 2.0 - 0.5, 0.0, float(size - 1))
        i0 = jnp.floor(src).astype(jnp.int32)
        i1 = jnp.minimum(i0 + 1, size - 1)
        frac = src - i0.astype(jnp.float32)
        return i0, i1, frac

    h0, h1, fh = src_idx(h)
    w0, w1, fw = src_idx(w)
    xh = x[:, :, h0, :] * (1.0 - fh)[None, None, :, None] + \
         x[:, :, h1, :] * fh[None, None, :, None]
    xw = xh[:, :, :, w0] * (1.0 - fw)[None, None, None, :] + \
         xh[:, :, :, w1] * fw[None, None, None, :]
    return xw


def _make_kernel(N, Cg, H, W, Wp, d, L, origin_q, F_q):
    NL = N * L                      # output lanes (batch folded into lanes, p = q*N + n)
    FL = N * F_q                    # padded-buffer lanes
    inner = origin_q * N            # 128-aligned lane offset of pixel (0,0)
    tail = FL - inner - NL          # right border strip of the padded buffer
    # tap lane-offsets (static): (ky-1)*d rows and (kx-1)*d cols, interleaved by N
    starts = [(origin_q + (ky - 1) * d * Wp + (kx - 1) * d) * N
              for ky in range(3) for kx in range(3)]
    inv_cnt = 1.0 / float(N * H * W)   # BN counts only valid positions

    def im2row(load_slice, patch_ref):
        # Build the (9*Cg, N*L) patch once; the 9 shifted loads are amortized
        # across all output channels of the fused matmul.
        for t, s in enumerate(starts):
            patch_ref[pl.ds(t * Cg, Cg), :] = load_slice(s)

    def bn(raw, gamma, beta, mask):
        # Training-mode BatchNorm2d, vectorized over channels, two-pass stats.
        rm = raw * mask
        mean = jnp.sum(rm, axis=1, keepdims=True) * inv_cnt             # (Cg, 1)
        cent = (raw - mean) * mask
        var = jnp.sum(cent * cent, axis=1, keepdims=True) * inv_cnt     # biased
        return (raw - mean) * (lax.rsqrt(var + _EPS) * gamma) + beta

    def kernel(bn_ref, w1_ref, w2_ref, x_ref, mask_ref, out_ref,
               apad_ref, patch_ref):
        mask = mask_ref[...]                                            # (1, NL)

        # ---- conv1: grouped dilated 3x3 == ONE MXU matmul (taps+channels fused
        #      along K, batch folded into lanes).
        im2row(lambda s: x_ref[0, :, pl.ds(s, NL)], patch_ref)
        raw1 = jnp.dot(w1_ref[0], patch_ref[...],
                       preferred_element_type=jnp.float32, precision=_PRECISION)

        # ---- bn1 + relu (full-slab); masked activation written with a single
        #      aligned lane-dense store -> conv2's zero padding for free.
        act1 = jnp.maximum(bn(raw1, bn_ref[0, 0], bn_ref[0, 1], mask), 0.0) * mask
        apad_ref[:, pl.ds(0, inner)] = jnp.zeros((Cg, inner), jnp.float32)
        if tail:
            apad_ref[:, pl.ds(inner + NL, tail)] = jnp.zeros((Cg, tail), jnp.float32)
        apad_ref[:, pl.ds(inner, NL)] = act1

        # ---- conv2 (same fused contraction, patch scratch reused)
        im2row(lambda s: apad_ref[:, pl.ds(s, NL)], patch_ref)
        raw2 = jnp.dot(w2_ref[0], patch_ref[...],
                       preferred_element_type=jnp.float32, precision=_PRECISION)

        # ---- bn2 + identity residual + relu; one full-slab aligned store.
        y2 = bn(raw2, bn_ref[0, 2], bn_ref[0, 3], mask)
        resid = x_ref[0, :, pl.ds(inner, NL)]
        out_ref[0, :, :] = jnp.maximum(y2 + resid, 0.0)

    return kernel


@functools.partial(jax.jit, static_argnames=("upsample", "dilation", "groups"))
def decoder1_forward(x, params, *, upsample, dilation, groups):
    """Pallas implementation of Decorder1.forward."""
    w1, w2, g1, b1, g2, b2 = params
    if upsample:
        x = _upsample2x_bilinear_nchw(x)
    x = x.astype(jnp.float32)
    N, Cin, H, W = x.shape
    Cout = w1.shape[0]
    assert Cin == Cout, "residual `block(x) + x` requires in_channel == out_channel"
    assert Cin % groups == 0 and Cout % groups == 0
    d = int(dilation)
    Cg = Cin // groups                       # per-group channels (== Cout // groups)

    Hp, Wp = H + 2 * d, W + 2 * d
    base = d * Wp + d                        # flat offset of pixel (0,0) in the padded plane
    origin_q = _round_up(base, 128)          # 128-aligned origin -> aligned interior stores
    L = _round_up(H * Wp, 128)               # lane-dense flattened output length per sample
    F_q = _round_up(max(origin_q + base + L, origin_q - base + Hp * Wp), 128)
    NL, FL = N * L, N * F_q
    off0 = origin_q - base

    # ---- pre-padded, lane-dense, batch-interleaved (p = q*N + n) input slab,
    #      built wrapper-side so the kernel does no padding copies / zero fills.
    xp = jnp.pad(x, ((0, 0), (0, 0), (d, d), (d, d)))                   # (N, C, Hp, Wp)
    xp = jnp.transpose(xp, (1, 2, 3, 0)).reshape(Cin, Hp * Wp * N)
    xp = jnp.pad(xp, ((0, 0), (off0 * N, FL - off0 * N - Hp * Wp * N)))
    xp = xp.reshape(groups, Cg, FL)

    # ---- per-group dense tap weights: (Cg, 9*Cg), contraction axis = (tap, cin).
    def tapify(w):
        cg_in = w.shape[1]
        wt = w.astype(jnp.float32).reshape(groups, Cg, cg_in, 3, 3)
        wt = jnp.transpose(wt, (0, 1, 3, 4, 2))                         # (g, co, ky, kx, ci)
        return wt.reshape(groups, Cg, 9 * cg_in)

    w1_t = tapify(w1)
    w2_t = tapify(w2)

    # BN gamma/beta as small VMEM column vectors, group-major: (groups, 4, Cg, 1)
    bn_params = jnp.stack([g1, b1, g2, b2]).astype(jnp.float32)         # (4, Cout)
    bn_params = bn_params.reshape(4, groups, Cg, 1).transpose(1, 0, 2, 3)

    # validity mask over output lanes p = q*N + n  (q = y*Wp + x; y < H, x < W)
    q = np.repeat(np.arange(L), N)
    mask = jnp.asarray(((q % Wp < W) & (q < H * Wp)).astype(np.float32)).reshape(1, NL)

    kernel = _make_kernel(N, Cg, H, W, Wp, d, L, origin_q, F_q)
    out_g = pl.pallas_call(
        kernel,
        out_shape=jax.ShapeDtypeStruct((groups, Cg, NL), jnp.float32),
        grid=(groups,),
        in_specs=[
            pl.BlockSpec((1, 4, Cg, 1), lambda g: (g, 0, 0, 0)),        # gamma/beta
            pl.BlockSpec((1, Cg, 9 * Cg), lambda g: (g, 0, 0)),         # conv1 tap weights
            pl.BlockSpec((1, Cg, 9 * Cg), lambda g: (g, 0, 0)),         # conv2 tap weights
            pl.BlockSpec((1, Cg, FL), lambda g: (g, 0, 0)),             # padded input slab
            pl.BlockSpec((1, NL), lambda g: (0, 0)),                    # validity mask
        ],
        out_specs=pl.BlockSpec((1, Cg, NL), lambda g: (g, 0, 0)),
        scratch_shapes=[
            pltpu.VMEM((Cg, FL), jnp.float32),       # zero-bordered conv1 activation
            pltpu.VMEM((9 * Cg, NL), jnp.float32),   # im2row patch (reused by both convs)
        ],
        compiler_params=pltpu.CompilerParams(
            # groups are fully independent end-to-end -> both TCs on v7x
            dimension_semantics=("parallel",),
            # stay well under v7x's 64 MiB physical VMEM (usage here is ~0.2 MiB)
            vmem_limit_bytes=48 * 1024 * 1024),
    )(bn_params, w1_t, w2_t, xp, mask)

    # batch-interleaved lane slab -> NCHW (cheap strided XLA glue fused under jit)
    out = out_g.reshape(Cout, L, N).transpose(2, 0, 1)                  # (N, Cout, L)
    return out[:, :, :H * Wp].reshape(N, Cout, H, Wp)[:, :, :, :W]


def decoder1_reference(x, params, *, upsample, dilation, groups):
    """Pure-JAX reference for the correctness check."""
    w1, w2, g1, b1, g2, b2 = params
    if upsample:
        x = _upsample2x_bilinear_nchw(x)
    x = x.astype(jnp.float32)
    d = int(dilation)

    def conv(v, w):
        return lax.conv_general_dilated(
            v, w, window_strides=(1, 1), padding=((d, d), (d, d)),
            rhs_dilation=(d, d), dimension_numbers=("NCHW", "OIHW", "NCHW"),
            feature_group_count=groups, precision=lax.Precision.HIGHEST)

    def bn(v, g, b):
        mean = v.mean(axis=(0, 2, 3), keepdims=True)
        var = ((v - mean) ** 2).mean(axis=(0, 2, 3), keepdims=True)
        return (v - mean) * lax.rsqrt(var + _EPS) * g.reshape(1, -1, 1, 1) \
            + b.reshape(1, -1, 1, 1)

    y = jnp.maximum(bn(conv(x, w1), g1, b1), 0.0)
    y = bn(conv(y, w2), g2, b2)
    return jnp.maximum(y + x, 0.0)


def init_params(key, in_channel, out_channel, groups):
    k1, k2 = jax.random.split(key)
    bound1 = 1.0 / float((in_channel // groups) * 9) ** 0.5
    bound2 = 1.0 / float((out_channel // groups) * 9) ** 0.5
    w1 = jax.random.uniform(k1, (out_channel, in_channel // groups, 3, 3),
                            jnp.float32, -bound1, bound1)
    w2 = jax.random.uniform(k2, (out_channel, out_channel // groups, 3, 3),
                            jnp.float32, -bound2, bound2)
    gamma1 = jnp.ones((out_channel,), jnp.float32)
    beta1 = jnp.zeros((out_channel,), jnp.float32)
    gamma2 = jnp.ones((out_channel,), jnp.float32)
    beta2 = jnp.zeros((out_channel,), jnp.float32)
    return w1, w2, gamma1, beta1, gamma2, beta2


if __name__ == "__main__":
    in_channel = out_channel = 4
    upsample, dilation, groups = True, 1, 2

    key = jax.random.PRNGKey(0)
    kx, kp = jax.random.split(key)
    x = jax.random.normal(kx, (2, in_channel, 8, 8), jnp.float32)   # NCHW, upsampled to 16x16
    params = init_params(kp, in_channel, out_channel, groups)

    out = decoder1_forward(x, params, upsample=upsample, dilation=dilation, groups=groups)
    out = jax.block_until_ready(out)

    ref = decoder1_reference(x, params, upsample=upsample, dilation=dilation, groups=groups)
    ref = jax.block_until_ready(ref)

    np.testing.assert_allclose(np.asarray(out), np.asarray(ref), rtol=1e-4, atol=1e-4)
    print("KERNEL_OK")
</pallas_src>

<mosaic_0001>
module attributes {stable_mosaic.version = 11 : i64} {
  func.func @kernel(%arg0: i32, %arg1: memref<1x4x2x1xf32, #tpu.memory_space<vmem>>, %arg2: memref<1x2x18xf32, #tpu.memory_space<vmem>>, %arg3: memref<1x2x18xf32, #tpu.memory_space<vmem>>, %arg4: memref<1x2x1280xf32, #tpu.memory_space<vmem>>, %arg5: memref<1x768xf32, #tpu.memory_space<vmem>>, %arg6: memref<1x2x768xf32, #tpu.memory_space<vmem>>, %arg7: memref<2x1280xf32, #tpu.memory_space<vmem>>, %arg8: memref<18x768xf32, #tpu.memory_space<vmem>>) attributes {dimension_semantics = [#tpu.dimension_semantics<parallel>], iteration_bounds = array<i64: 2>, scalar_prefetch = 0 : i64, scratch_operands = 2 : i64, tpu.core_type = #tpu.core_type<tc>, window_params = [{transform_indices = @transform_0, window_bounds = array<i64: 1, 4, 2, 1>}, {transform_indices = @transform_1, window_bounds = array<i64: 1, 2, 18>}, {transform_indices = @transform_2, window_bounds = array<i64: 1, 2, 18>}, {transform_indices = @transform_3, window_bounds = array<i64: 1, 2, 1280>}, {pipeline_mode = #tpu.pipeline_mode<synchronous>, transform_indices = @transform_4, window_bounds = array<i64: 1, 768>}, {transform_indices = @transform_5, window_bounds = array<i64: 1, 2, 768>}]} {
    %c0 = arith.constant 0 : index
    %c0_0 = arith.constant 0 : index
    %0 = vector.load %arg5[%c0, %c0_0] : memref<1x768xf32, #tpu.memory_space<vmem>>, vector<1x768xf32>
    %c0_1 = arith.constant 0 : index
    %c0_2 = arith.constant 0 : index
    %c218 = arith.constant 218 : index
    %1 = vector.load %arg4[%c0_1, %c0_2, %c218] : memref<1x2x1280xf32, #tpu.memory_space<vmem>>, vector<1x2x768xf32>
    %2 = vector.shape_cast %1 : vector<1x2x768xf32> to vector<2x768xf32>
    %c0_3 = arith.constant 0 : index
    %c0_4 = arith.constant 0 : index
    %3 = vector.load %arg8[%c0_3, %c0_4] : memref<18x768xf32, #tpu.memory_space<vmem>>, vector<2x768xf32>
    tpu.vector_store %arg8[%c0_3, %c0_4], %2 {strides = array<i32>} : memref<18x768xf32, #tpu.memory_space<vmem>>, vector<2x768xf32>,
    %c0_5 = arith.constant 0 : index
    %c0_6 = arith.constant 0 : index
    %c220 = arith.constant 220 : index
    %4 = vector.load %arg4[%c0_5, %c0_6, %c220] : memref<1x2x1280xf32, #tpu.memory_space<vmem>>, vector<1x2x768xf32>
    %5 = vector.shape_cast %4 : vector<1x2x768xf32> to vector<2x768xf32>
    %c2 = arith.constant 2 : index
    %c0_7 = arith.constant 0 : index
    %6 = vector.load %arg8[%c2, %c0_7] : memref<18x768xf32, #tpu.memory_space<vmem>>, vector<2x768xf32>
    tpu.vector_store %arg8[%c2, %c0_7], %5 {strides = array<i32>} : memref<18x768xf32, #tpu.memory_space<vmem>>, vector<2x768xf32>,
    %c0_8 = arith.constant 0 : index
    %c0_9 = arith.constant 0 : index
    %c222 = arith.constant 222 : index
    %7 = vector.load %arg4[%c0_8, %c0_9, %c222] : memref<1x2x1280xf32, #tpu.memory_space<vmem>>, vector<1x2x768xf32>
    %8 = vector.shape_cast %7 : vector<1x2x768xf32> to vector<2x768xf32>
    %c4 = arith.constant 4 : index
    %c0_10 = arith.constant 0 : index
    %9 = vector.load %arg8[%c4, %c0_10] : memref<18x768xf32, #tpu.memory_space<vmem>>, vector<2x768xf32>
    tpu.vector_store %arg8[%c4, %c0_10], %8 {strides = array<i32>} : memref<18x768xf32, #tpu.memory_space<vmem>>, vector<2x768xf32>,
    %c0_11 = arith.constant 0 : index
    %c0_12 = arith.constant 0 : index
    %c254 = arith.constant 254 : index
    %10 = vector.load %arg4[%c0_11, %c0_12, %c254] : memref<1x2x1280xf32, #tpu.memory_space<vmem>>, vector<1x2x768xf32>
    %11 = vector.shape_cast %10 : vector<1x2x768xf32> to vector<2x768xf32>
    %c6 = arith.constant 6 : index
    %c0_13 = arith.constant 0 : index
    %12 = vector.load %arg8[%c6, %c0_13] : memref<18x768xf32, #tpu.memory_space<vmem>>, vector<2x768xf32>
    tpu.vector_store %arg8[%c6, %c0_13], %11 {strides = array<i32>} : memref<18x768xf32, #tpu.memory_space<vmem>>, vector<2x768xf32>,
    %c0_14 = arith.constant 0 : index
    %c0_15 = arith.constant 0 : index
    %c256 = arith.constant 256 : index
    %13 = vector.load %arg4[%c0_14, %c0_15, %c256] : memref<1x2x1280xf32, #tpu.memory_space<vmem>>, vector<1x2x768xf32>
    %14 = vector.shape_cast %13 : vector<1x2x768xf32> to vector<2x768xf32>
    %c8 = arith.constant 8 : index
    %c0_16 = arith.constant 0 : index
    %15 = vector.load %arg8[%c8, %c0_16] : memref<18x768xf32, #tpu.memory_space<vmem>>, vector<2x768xf32>
    tpu.vector_store %arg8[%c8, %c0_16], %14 {strides = array<i32>} : memref<18x768xf32, #tpu.memory_space<vmem>>, vector<2x768xf32>,
    %c0_17 = arith.constant 0 : index
    %c0_18 = arith.constant 0 : index
    %c258 = arith.constant 258 : index
    %16 = vector.load %arg4[%c0_17, %c0_18, %c258] : memref<1x2x1280xf32, #tpu.memory_space<vmem>>, vector<1x2x768xf32>
    %17 = vector.shape_cast %16 : vector<1x2x768xf32> to vector<2x768xf32>
    %c10 = arith.constant 10 : index
    %c0_19 = arith.constant 0 : index
    %18 = vector.load %arg8[%c10, %c0_19] : memref<18x768xf32, #tpu.memory_space<vmem>>, vector<2x768xf32>
    tpu.vector_store %arg8[%c10, %c0_19], %17 {strides = array<i32>} : memref<18x768xf32, #tpu.memory_space<vmem>>, vector<2x768xf32>,
    %c0_20 = arith.constant 0 : index
    %c0_21 = arith.constant 0 : index
    %c290 = arith.constant 290 : index
    %19 = vector.load %arg4[%c0_20, %c0_21, %c290] : memref<1x2x1280xf32, #tpu.memory_space<vmem>>, vector<1x2x768xf32>
    %20 = vector.shape_cast %19 : vector<1x2x768xf32> to vector<2x768xf32>
    %c12 = arith.constant 12 : index
    %c0_22 = arith.constant 0 : index
    %21 = vector.load %arg8[%c12, %c0_22] : memref<18x768xf32, #tpu.memory_space<vmem>>, vector<2x768xf32>
    tpu.vector_store %arg8[%c12, %c0_22], %20 {strides = array<i32>} : memref<18x768xf32, #tpu.memory_space<vmem>>, vector<2x768xf32>,
    %c0_23 = arith.constant 0 : index
    %c0_24 = arith.constant 0 : index
    %c292 = arith.constant 292 : index
    %22 = vector.load %arg4[%c0_23, %c0_24, %c292] : memref<1x2x1280xf32, #tpu.memory_space<vmem>>, vector<1x2x768xf32>
    %23 = vector.shape_cast %22 : vector<1x2x768xf32> to vector<2x768xf32>
    %c14 = arith.constant 14 : index
    %c0_25 = arith.constant 0 : index
    %24 = vector.load %arg8[%c14, %c0_25] : memref<18x768xf32, #tpu.memory_space<vmem>>, vector<2x768xf32>
    tpu.vector_store %arg8[%c14, %c0_25], %23 {strides = array<i32>} : memref<18x768xf32, #tpu.memory_space<vmem>>, vector<2x768xf32>,
    %c0_26 = arith.constant 0 : index
    %c0_27 = arith.constant 0 : index
    %c294 = arith.constant 294 : index
    %25 = vector.load %arg4[%c0_26, %c0_27, %c294] : memref<1x2x1280xf32, #tpu.memory_space<vmem>>, vector<1x2x768xf32>
    %26 = vector.shape_cast %25 : vector<1x2x768xf32> to vector<2x768xf32>
    %c16 = arith.constant 16 : index
    %c0_28 = arith.constant 0 : index
    %27 = vector.load %arg8[%c16, %c0_28] : memref<18x768xf32, #tpu.memory_space<vmem>>, vector<2x768xf32>
    tpu.vector_store %arg8[%c16, %c0_28], %26 {strides = array<i32>} : memref<18x768xf32, #tpu.memory_space<vmem>>, vector<2x768xf32>,
    %c0_29 = arith.constant 0 : index
    %c0_30 = arith.constant 0 : index
    %c0_31 = arith.constant 0 : index
    %28 = vector.load %arg2[%c0_29, %c0_30, %c0_31] : memref<1x2x18xf32, #tpu.memory_space<vmem>>, vector<1x2x18xf32>
    %29 = vector.shape_cast %28 : vector<1x2x18xf32> to vector<2x18xf32>
    %c0_32 = arith.constant 0 : index
    %c0_33 = arith.constant 0 : index
    %30 = vector.load %arg8[%c0_32, %c0_33] : memref<18x768xf32, #tpu.memory_space<vmem>>, vector<18x768xf32>
    %cst = arith.constant dense<0.000000e+00> : vector<2x768xf32>
    %31 = tpu.matmul %29, %30, %cst {dimension_numbers = #tpu.dot_dimension_numbers<[1], [0], [0], [1], [0, 0, 1, 1], [], []>, precision = #tpu.contract_precision<fp32>} : vector<2x18xf32>, vector<18x768xf32>, vector<2x768xf32> -> vector<2x768xf32>
    %c0_34 = arith.constant 0 : index
    %c0_35 = arith.constant 0 : index
    %c0_36 = arith.constant 0 : index
    %c0_37 = arith.constant 0 : index
    %32 = vector.load %arg1[%c0_34, %c0_35, %c0_36, %c0_37] : memref<1x4x2x1xf32, #tpu.memory_space<vmem>>, vector<1x1x2x1xf32>
    %33 = vector.shape_cast %32 : vector<1x1x2x1xf32> to vector<2x1xf32>
    %c0_38 = arith.constant 0 : index
    %c1 = arith.constant 1 : index
    %c0_39 = arith.constant 0 : index
    %c0_40 = arith.constant 0 : index
    %34 = vector.load %arg1[%c0_38, %c1, %c0_39, %c0_40] : memref<1x4x2x1xf32, #tpu.memory_space<vmem>>, vector<1x1x2x1xf32>
    %35 = vector.shape_cast %34 : vector<1x1x2x1xf32> to vector<2x1xf32>
    %36 = vector.broadcast %0 : vector<1x768xf32> to vector<2x768xf32>
    %37 = arith.mulf %31, %36 : vector<2x768xf32>
    %cst_41 = arith.constant dense<0.000000e+00> : vector<2xf32>
    %38 = vector.multi_reduction <add>, %37, %cst_41 [1] : vector<2x768xf32> to vector<2xf32>
    %39 = vector.shape_cast %38 : vector<2xf32> to vector<2x1xf32>
    %cst_42 = arith.constant 0.001953125 : f32
    %40 = vector.broadcast %cst_42 : f32 to vector<2x1xf32>
    %41 = arith.mulf %39, %40 : vector<2x1xf32>
    %42 = vector.broadcast %41 : vector<2x1xf32> to vector<2x768xf32>
    %43 = arith.subf %31, %42 : vector<2x768xf32>
    %44 = vector.broadcast %0 : vector<1x768xf32> to vector<2x768xf32>
    %45 = arith.mulf %43, %44 : vector<2x768xf32>
    %46 = arith.mulf %45, %45 : vector<2x768xf32>
    %cst_43 = arith.constant dense<0.000000e+00> : vector<2xf32>
    %47 = vector.multi_reduction <add>, %46, %cst_43 [1] : vector<2x768xf32> to vector<2xf32>
    %48 = vector.shape_cast %47 : vector<2xf32> to vector<2x1xf32>
    %cst_44 = arith.constant 0.001953125 : f32
    %49 = vector.broadcast %cst_44 : f32 to vector<2x1xf32>
    %50 = arith.mulf %48, %49 : vector<2x1xf32>
    %51 = vector.broadcast %41 : vector<2x1xf32> to vector<2x768xf32>
    %52 = arith.subf %31, %51 : vector<2x768xf32>
    %cst_45 = arith.constant 9.99999974E-6 : f32
    %53 = vector.broadcast %cst_45 : f32 to vector<2x1xf32>
    %54 = arith.addf %50, %53 : vector<2x1xf32>
    %55 = math.rsqrt %54 : vector<2x1xf32>
    %56 = arith.mulf %55, %33 : vector<2x1xf32>
    %57 = vector.broadcast %56 : vector<2x1xf32> to vector<2x768xf32>
    %58 = arith.mulf %52, %57 : vector<2x768xf32>
    %59 = vector.broadcast %35 : vector<2x1xf32> to vector<2x768xf32>
    %60 = arith.addf %58, %59 : vector<2x768xf32>
    %cst_46 = arith.constant 0.000000e+00 : f32
    %61 = vector.broadcast %cst_46 : f32 to vector<2x768xf32>
    %62 = arith.maximumf %60, %61 : vector<2x768xf32>
    %63 = vector.broadcast %0 : vector<1x768xf32> to vector<2x768xf32>
    %64 = arith.mulf %62, %63 : vector<2x768xf32>
    %cst_47 = arith.constant 0.000000e+00 : f32
    %65 = vector.broadcast %cst_47 : f32 to vector<2x256xf32>
    %c0_48 = arith.constant 0 : index
    %c0_49 = arith.constant 0 : index
    %66 = vector.load %arg7[%c0_48, %c0_49] : memref<2x1280xf32, #tpu.memory_space<vmem>>, vector<2x256xf32>
    tpu.vector_store %arg7[%c0_48, %c0_49], %65 {strides = array<i32>} : memref<2x1280xf32, #tpu.memory_space<vmem>>, vector<2x256xf32>,
    %cst_50 = arith.constant 0.000000e+00 : f32
    %67 = vector.broadcast %cst_50 : f32 to vector<2x256xf32>
    %c0_51 = arith.constant 0 : index
    %c1024 = arith.constant 1024 : index
    %68 = vector.load %arg7[%c0_51, %c1024] : memref<2x1280xf32, #tpu.memory_space<vmem>>, vector<2x256xf32>
    tpu.vector_store %arg7[%c0_51, %c1024], %67 {strides = array<i32>} : memref<2x1280xf32, #tpu.memory_space<vmem>>, vector<2x256xf32>,
    %c0_52 = arith.constant 0 : index
    %c256_53 = arith.constant 256 : index
    %69 = vector.load %arg7[%c0_52, %c256_53] : memref<2x1280xf32, #tpu.memory_space<vmem>>, vector<2x768xf32>
    tpu.vector_store %arg7[%c0_52, %c256_53], %64 {strides = array<i32>} : memref<2x1280xf32, #tpu.memory_space<vmem>>, vector<2x768xf32>,
    %c0_54 = arith.constant 0 : index
    %c218_55 = arith.constant 218 : index
    %70 = vector.load %arg7[%c0_54, %c218_55] : memref<2x1280xf32, #tpu.memory_space<vmem>>, vector<2x768xf32>
    %c0_56 = arith.constant 0 : index
    %c0_57 = arith.constant 0 : index
    %71 = vector.load %arg8[%c0_56, %c0_57] : memref<18x768xf32, #tpu.memory_space<vmem>>, vector<2x768xf32>
    tpu.vector_store %arg8[%c0_56, %c0_57], %70 {strides = array<i32>} : memref<18x768xf32, #tpu.memory_space<vmem>>, vector<2x768xf32>,
    %c0_58 = arith.constant 0 : index
    %c220_59 = arith.constant 220 : index
    %72 = vector.load %arg7[%c0_58, %c220_59] : memref<2x1280xf32, #tpu.memory_space<vmem>>, vector<2x768xf32>
    %c2_60 = arith.constant 2 : index
    %c0_61 = arith.constant 0 : index
    %73 = vector.load %arg8[%c2_60, %c0_61] : memref<18x768xf32, #tpu.memory_space<vmem>>, vector<2x768xf32>
    tpu.vector_store %arg8[%c2_60, %c0_61], %72 {strides = array<i32>} : memref<18x768xf32, #tpu.memory_space<vmem>>, vector<2x768xf32>,
    %c0_62 = arith.constant 0 : index
    %c222_63 = arith.constant 222 : index
    %74 = vector.load %arg7[%c0_62, %c222_63] : memref<2x1280xf32, #tpu.memory_space<vmem>>, vector<2x768xf32>
    %c4_64 = arith.constant 4 : index
    %c0_65 = arith.constant 0 : index
    %75 = vector.load %arg8[%c4_64, %c0_65] : memref<18x768xf32, #tpu.memory_space<vmem>>, vector<2x768xf32>
    tpu.vector_store %arg8[%c4_64, %c0_65], %74 {strides = array<i32>} : memref<18x768xf32, #tpu.memory_space<vmem>>, vector<2x768xf32>,
    %c0_66 = arith.constant 0 : index
    %c254_67 = arith.constant 254 : index
    %76 = vector.load %arg7[%c0_66, %c254_67] : memref<2x1280xf32, #tpu.memory_space<vmem>>, vector<2x768xf32>
    %c6_68 = arith.constant 6 : index
    %c0_69 = arith.constant 0 : index
    %77 = vector.load %arg8[%c6_68, %c0_69] : memref<18x768xf32, #tpu.memory_space<vmem>>, vector<2x768xf32>
    tpu.vector_store %arg8[%c6_68, %c0_69], %76 {strides = array<i32>} : memref<18x768xf32, #tpu.memory_space<vmem>>, vector<2x768xf32>,
    %c0_70 = arith.constant 0 : index
    %c256_71 = arith.constant 256 : index
    %78 = vector.load %arg7[%c0_70, %c256_71] : memref<2x1280xf32, #tpu.memory_space<vmem>>, vector<2x768xf32>
    %c8_72 = arith.constant 8 : index
    %c0_73 = arith.constant 0 : index
    %79 = vector.load %arg8[%c8_72, %c0_73] : memref<18x768xf32, #tpu.memory_space<vmem>>, vector<2x768xf32>
    tpu.vector_store %arg8[%c8_72, %c0_73], %78 {strides = array<i32>} : memref<18x768xf32, #tpu.memory_space<vmem>>, vector<2x768xf32>,
    %c0_74 = arith.constant 0 : index
    %c258_75 = arith.constant 258 : index
    %80 = vector.load %arg7[%c0_74, %c258_75] : memref<2x1280xf32, #tpu.memory_space<vmem>>, vector<2x768xf32>
    %c10_76 = arith.constant 10 : index
    %c0_77 = arith.constant 0 : index
    %81 = vector.load %arg8[%c10_76, %c0_77] : memref<18x768xf32, #tpu.memory_space<vmem>>, vector<2x768xf32>
    tpu.vector_store %arg8[%c10_76, %c0_77], %80 {strides = array<i32>} : memref<18x768xf32, #tpu.memory_space<vmem>>, vector<2x768xf32>,
    %c0_78 = arith.constant 0 : index
    %c290_79 = arith.constant 290 : index
    %82 = vector.load %arg7[%c0_78, %c290_79] : memref<2x1280xf32, #tpu.memory_space<vmem>>, vector<2x768xf32>
    %c12_80 = arith.constant 12 : index
    %c0_81 = arith.constant 0 : index
    %83 = vector.load %arg8[%c12_80, %c0_81] : memref<18x768xf32, #tpu.memory_space<vmem>>, vector<2x768xf32>
    tpu.vector_store %arg8[%c12_80, %c0_81], %82 {strides = array<i32>} : memref<18x768xf32, #tpu.memory_space<vmem>>, vector<2x768xf32>,
    %c0_82 = arith.constant 0 : index
    %c292_83 = arith.constant 292 : index
    %84 = vector.load %arg7[%c0_82, %c292_83] : memref<2x1280xf32, #tpu.memory_space<vmem>>, vector<2x768xf32>
    %c14_84 = arith.constant 14 : index
    %c0_85 = arith.constant 0 : index
    %85 = vector.load %arg8[%c14_84, %c0_85] : memref<18x768xf32, #tpu.memory_space<vmem>>, vector<2x768xf32>
    tpu.vector_store %arg8[%c14_84, %c0_85], %84 {strides = array<i32>} : memref<18x768xf32, #tpu.memory_space<vmem>>, vector<2x768xf32>,
    %c0_86 = arith.constant 0 : index
    %c294_87 = arith.constant 294 : index
    %86 = vector.load %arg7[%c0_86, %c294_87] : memref<2x1280xf32, #tpu.memory_space<vmem>>, vector<2x768xf32>
    %c16_88 = arith.constant 16 : index
    %c0_89 = arith.constant 0 : index
    %87 = vector.load %arg8[%c16_88, %c0_89] : memref<18x768xf32, #tpu.memory_space<vmem>>, vector<2x768xf32>
    tpu.vector_store %arg8[%c16_88, %c0_89], %86 {strides = array<i32>} : memref<18x768xf32, #tpu.memory_space<vmem>>, vector<2x768xf32>,
    %c0_90 = arith.constant 0 : index
    %c0_91 = arith.constant 0 : index
    %c0_92 = arith.constant 0 : index
    %88 = vector.load %arg3[%c0_90, %c0_91, %c0_92] : memref<1x2x18xf32, #tpu.memory_space<vmem>>, vector<1x2x18xf32>
    %89 = vector.shape_cast %88 : vector<1x2x18xf32> to vector<2x18xf32>
    %c0_93 = arith.constant 0 : index
    %c0_94 = arith.constant 0 : index
    %90 = vector.load %arg8[%c0_93, %c0_94] : memref<18x768xf32, #tpu.memory_space<vmem>>, vector<18x768xf32>
    %cst_95 = arith.constant dense<0.000000e+00> : vector<2x768xf32>
    %91 = tpu.matmul %89, %90, %cst_95 {dimension_numbers = #tpu.dot_dimension_numbers<[1], [0], [0], [1], [0, 0, 1, 1], [], []>, precision = #tpu.contract_precision<fp32>} : vector<2x18xf32>, vector<18x768xf32>, vector<2x768xf32> -> vector<2x768xf32>
    %c0_96 = arith.constant 0 : index
    %c2_97 = arith.constant 2 : index
    %c0_98 = arith.constant 0 : index
    %c0_99 = arith.constant 0 : index
    %92 = vector.load %arg1[%c0_96, %c2_97, %c0_98, %c0_99] : memref<1x4x2x1xf32, #tpu.memory_space<vmem>>, vector<1x1x2x1xf32>
    %93 = vector.shape_cast %92 : vector<1x1x2x1xf32> to vector<2x1xf32>
    %c0_100 = arith.constant 0 : index
    %c3 = arith.constant 3 : index
    %c0_101 = arith.constant 0 : index
    %c0_102 = arith.constant 0 : index
    %94 = vector.load %arg1[%c0_100, %c3, %c0_101, %c0_102] : memref<1x4x2x1xf32, #tpu.memory_space<vmem>>, vector<1x1x2x1xf32>
    %95 = vector.shape_cast %94 : vector<1x1x2x1xf32> to vector<2x1xf32>
    %96 = vector.broadcast %0 : vector<1x768xf32> to vector<2x768xf32>
    %97 = arith.mulf %91, %96 : vector<2x768xf32>
    %cst_103 = arith.constant dense<0.000000e+00> : vector<2xf32>
    %98 = vector.multi_reduction <add>, %97, %cst_103 [1] : vector<2x768xf32> to vector<2xf32>
    %99 = vector.shape_cast %98 : vector<2xf32> to vector<2x1xf32>
    %cst_104 = arith.constant 0.001953125 : f32
    %100 = vector.broadcast %cst_104 : f32 to vector<2x1xf32>
    %101 = arith.mulf %99, %100 : vector<2x1xf32>
    %102 = vector.broadcast %101 : vector<2x1xf32> to vector<2x768xf32>
    %103 = arith.subf %91, %102 : vector<2x768xf32>
    %104 = vector.broadcast %0 : vector<1x768xf32> to vector<2x768xf32>
    %105 = arith.mulf %103, %104 : vector<2x768xf32>
    %106 = arith.mulf %105, %105 : vector<2x768xf32>
    %cst_105 = arith.constant dense<0.000000e+00> : vector<2xf32>
    %107 = vector.multi_reduction <add>, %106, %cst_105 [1] : vector<2x768xf32> to vector<2xf32>
    %108 = vector.shape_cast %107 : vector<2xf32> to vector<2x1xf32>
    %cst_106 = arith.constant 0.001953125 : f32
    %109 = vector.broadcast %cst_106 : f32 to vector<2x1xf32>
    %110 = arith.mulf %108, %109 : vector<2x1xf32>
    %111 = vector.broadcast %101 : vector<2x1xf32> to vector<2x768xf32>
    %112 = arith.subf %91, %111 : vector<2x768xf32>
    %cst_107 = arith.constant 9.99999974E-6 : f32
    %113 = vector.broadcast %cst_107 : f32 to vector<2x1xf32>
    %114 = arith.addf %110, %113 : vector<2x1xf32>
    %115 = math.rsqrt %114 : vector<2x1xf32>
    %116 = arith.mulf %115, %93 : vector<2x1xf32>
    %117 = vector.broadcast %116 : vector<2x1xf32> to vector<2x768xf32>
    %118 = arith.mulf %112, %117 : vector<2x768xf32>
    %119 = vector.broadcast %95 : vector<2x1xf32> to vector<2x768xf32>
    %120 = arith.addf %118, %119 : vector<2x768xf32>
    %c0_108 = arith.constant 0 : index
    %c0_109 = arith.constant 0 : index
    %c256_110 = arith.constant 256 : index
    %121 = vector.load %arg4[%c0_108, %c0_109, %c256_110] : memref<1x2x1280xf32, #tpu.memory_space<vmem>>, vector<1x2x768xf32>
    %122 = vector.shape_cast %121 : vector<1x2x768xf32> to vector<2x768xf32>
    %123 = arith.addf %120, %122 : vector<2x768xf32>
    %cst_111 = arith.constant 0.000000e+00 : f32
    %124 = vector.broadcast %cst_111 : f32 to vector<2x768xf32>
    %125 = arith.maximumf %123, %124 : vector<2x768xf32>
    %c0_112 = arith.constant 0 : index
    %c0_113 = arith.constant 0 : index
    %c0_114 = arith.constant 0 : index
    %126 = vector.load %arg6[%c0_112, %c0_113, %c0_114] : memref<1x2x768xf32, #tpu.memory_space<vmem>>, vector<1x2x768xf32>
    %127 = vector.shape_cast %126 : vector<1x2x768xf32> to vector<2x768xf32>
    %128 = vector.shape_cast %125 : vector<2x768xf32> to vector<1x2x768xf32>
    tpu.vector_store %arg6[%c0_112, %c0_113, %c0_114], %128 {strides = array<i32>} : memref<1x2x768xf32, #tpu.memory_space<vmem>>, vector<1x2x768xf32>,
    return
  }
  func.func @transform_0(%arg0: i32) -> (i32, i32, i32, i32) {
    %c0_i32 = arith.constant 0 : i32
    %c0_i32_0 = arith.constant 0 : i32
    %c0_i32_1 = arith.constant 0 : i32
    %c0_i32_2 = arith.constant 0 : i32
    return %arg0, %c0_i32, %c0_i32_0, %c0_i32_1 : i32, i32, i32, i32
  }
  func.func @transform_1(%arg0: i32) -> (i32, i32, i32) {
    %c0_i32 = arith.constant 0 : i32
    %c0_i32_0 = arith.constant 0 : i32
    %c0_i32_1 = arith.constant 0 : i32
    return %arg0, %c0_i32, %c0_i32_0 : i32, i32, i32
  }
  func.func @transform_2(%arg0: i32) -> (i32, i32, i32) {
    %c0_i32 = arith.constant 0 : i32
    %c0_i32_0 = arith.constant 0 : i32
    %c0_i32_1 = arith.constant 0 : i32
    return %arg0, %c0_i32, %c0_i32_0 : i32, i32, i32
  }
  func.func @transform_3(%arg0: i32) -> (i32, i32, i32) {
    %c0_i32 = arith.constant 0 : i32
    %c0_i32_0 = arith.constant 0 : i32
    %c0_i32_1 = arith.constant 0 : i32
    return %arg0, %c0_i32, %c0_i32_0 : i32, i32, i32
  }
  func.func @transform_4(%arg0: i32) -> (i32, i32) {
    %c0_i32 = arith.constant 0 : i32
    %c0_i32_0 = arith.constant 0 : i32
    %c0_i32_1 = arith.constant 0 : i32
    return %c0_i32, %c0_i32_0 : i32, i32
  }
  func.func @transform_5(%arg0: i32) -> (i32, i32, i32) {
    %c0_i32 = arith.constant 0 : i32
    %c0_i32_0 = arith.constant 0 : i32
    %c0_i32_1 = arith.constant 0 : i32
    return %arg0, %c0_i32, %c0_i32_0 : i32, i32, i32
  }
}

</mosaic_0001>

<bundles_post_ra>
// kernel: decoder1_forward.1
= control target key start
LH: loop header
LB: loop body
LE: loop exit
PB: predicated region body
PF: predicated region fallthrough
CT: control target
= control target key end

     0   :  { %s5411_s18 = smov 0   ;;  %s6559_s0 = inlined_call_operand.vmem [shape: f32[2,4,2,1], index: 0, kind: input, shape index: {}]   ;;  %s6560_s1 = inlined_call_operand.vmem [shape: f32[2,2,18], index: 1, kind: input, shape index: {}]   ;;  %s6561_s2 = inlined_call_operand.vmem [shape: f32[2,2,18], index: 2, kind: input, shape index: {}]   ;;  %s6562_s3 = inlined_call_operand.vmem [shape: f32[2,2,1280], index: 3, kind: input, shape index: {}]   ;;  %s6563_s4 = inlined_call_operand.vmem [shape: f32[1,768], index: 4, kind: input, shape index: {}]   ;;  %s6564_s5 = inlined_call_operand.vmem [shape: f32[2,2,768], index: 5, kind: output, shape index: {}]  }
   0x1 LB: > { %s5080_s19 = sadd.s32 4294967295, %s5368_s18   ;;  %p5084_p0 = scmp.ge.s32.totalorder %s5368_s18, 1  ;;  %s5368_s18 = sphi %s5411_s18, %s15_s18  }
   0x2   : > { %p215_p1 = scmp.lt.s32.totalorder %s5368_s18, 3 }
   0x4   : > { %p216_p2 = pnand %p5084_p0, %p215_p1 }
   0x5   : > { %p256_p3 = scmp.lt.s32.totalorder (!%p216_p2), %s5080_s19, 1  ;;  %v288_v0 = vlaneseq (!%p216_p2)  ;;  %v5370_v1 = vmov (!%p216_p2), 1983009808   ;;  %s5371_s24 = smov (!%p216_p2), 34   ;;  %v5379_v34 = vmov (!%p216_p2), 0.0   ;;  %vm904_vm0 = vcmask (!%p216_p2), 146432  }
   0x6   : > { %219 = sbr.rel (%p216_p2) target bundleno = 1959 (0x7a7), region = 40  ;;  %v286_v2 = vunpack.c.l.s4 (!%p216_p2), %v5370_v1  ;;  %s5372_s25 = smov (!%p216_p2), 36   ;;  %2601 = vst [vmem:[#allocation2] sm:$0xf] (!%p216_p2), %v5379_v34  ;;  %2602 = vst [vmem:[#allocation2 + $0x10] sm:$0xf] (!%p216_p2), %v5379_v34  ;;  %997 = vmatprep.mubr.f32.mxu0 (!%p216_p2), %v5379_v34  ;;  %1514 = vmatprep.mubr.f32.mxu1 (!%p216_p2), %v5379_v34 }
   0x7   : > { %v5421_v3 = vshrl.u32 (!%p216_p2), %v288_v0, 7  ;;  %s5373_s26 = smov (!%p216_p2), 2   ;;  %s5374_s27 = smov (!%p216_p2), 38   ;;  %vm401_vm1 = vcmask (!%p216_p2), 293888   ;;  %vm331_vm2 = vcmask (!%p216_p2), 310272   ;;  %vm472_vm3 = vcmask (!%p216_p2), 277504  }
   0x8   : > { %v287_v4 = vunpack.c.0.s8 (!%p216_p2), %v286_v2  ;;  %s5375_s28 = smov (!%p216_p2), 126   ;;  %s5376_s29 = smov (!%p216_p2), 94   ;;  %vm543_vm4 = vcmask (!%p216_p2), 15360   ;;  %vm654_vm5 = vcmask (!%p216_p2), 1031168   ;;  %vm725_vm6 = vcmask (!%p216_p2), 769024  }
   0x9   : > { %s5377_s30 = smov (!%p216_p2), 92   ;;  %s5378_s6 = smov (!%p216_p2), 90   ;;  %vm796_vm7 = vcmask (!%p216_p2), 752640   ;;  %vm866_vm8 = vcmask (!%p216_p2), 736256   ;;  %vm908_vm9 = vcmask (!%p216_p2), 1041408  }
   0xa   : > { %v5425_v5 = vsub.s32 (!%p216_p2), %v287_v4, %v5421_v3 }
   0xd   : > { %s6566_s19 = smov (!%p256_p3, %s5080_s19), 1 }
   0xe   : > { %s5310_s20 = smul.u32 20, %s6566_s19  ;;  %s5087_s7 = sshll.u32 %s6566_s19, 1 }
   0xf   : > { %s268_s10 = scalar_lea.vmem %s6561_s2, %s5087_s7  ;;  %s264_s13 = scalar_lea.vmem %s6560_s1, %s5087_s7 }
  0x10   : > { %s5430_s23 = scalar_lea.vmem %s6562_s3, %s5310_s20  ;;  %v3235_v36 = vld [vmem:[%s268_s10] sm:$0x3]  ;;  %s5105_s16 = sshll.u32 %s6566_s19, 3 }
  0x11   : > { %v420_v6 = vld [vmem:[%s5430_s23 + $0x2] sm:$0xff]  ;;  %v281_v28 = vld [vmem:[%s5430_s23 + $0xa] sm:$0x3f]  ;;  %v5517_v37 = vsel %vm904_vm0, %v3235_v36, 0  ;;  %s6011_s21 = scalar_lea.vmem %s6559_s0, %s5105_s16  ;;  %s5311_s22 = smul.u32 12, %s6566_s19 }
  0x12   : > { %v603_v7 = vld [vmem:[%s5430_s23 + $0x4] sm:$0xff]  ;;  %v5435_v8 = vrot.slane %v420_v6, %v5425_v5  ;;  %v354_v9 = vcombine.low %v420_v6, %v420_v6  ;;  %v424_v11 = vcombine.high %v420_v6, %v420_v6  ;;  %v308_v30 = vrot.slane %v281_v28, %v5425_v5  ;;  %v604_v43 = vld [vmem:[%s5430_s23 + $0xc] sm:$0x3f] }
  0x13   : > { %5092 = vst.sshfl [vmem:[#allocation3 + $0x30] sm:$0x3 pattern:$0x76325410] %v603_v7  ;;  %v677_v10 = vcombine.high %v603_v7, %v603_v7  ;;  %v5449_v15 = vrot.slane %v603_v7, %v5425_v5  ;;  %v607_v18 = vcombine.low %v603_v7, %v603_v7  ;;  %v351_v29 = vld [vmem:[%s5430_s23 + $0xa] sm:$0x3f]  ;;  %v624_v45 = vcombine.low %v604_v43, %v604_v43 }
  0x14   : > { %460 = vrot.lane.b32.xlu0 %v5435_v8, %s5371_s24  ;;  %v439_v12 = vcombine.low %v5435_v8, %v5435_v8  ;;  %391 = vrot.lane.b32.xlu1 %v5435_v8, %s5372_s25  ;;  %v361_v13 = vrot.slane %v354_v9, %v5425_v5  ;;  %v5446_v14 = vcombine.high %v5435_v8, %v5435_v8  ;;  %v421_v33 = vld [vmem:[%s5430_s23 + $0xa] sm:$0x3f] }
  0x15   : > { %5093 = vst.sshfl [vmem:[#allocation3 + $0x40] sm:$0x3 pattern:$0x76325410] %v677_v10  ;;  %v5452_v16 = vrot.slane %v424_v11, %v5425_v5  ;;  %v5459_v19 = vcombine.high %v5449_v15, %v5449_v15  ;;  %v614_v21 = vrot.slane %v607_v18, %v5425_v5  ;;  %v5471_v23 = vrot.slane %v677_v10, %v5425_v5  ;;  %v492_v35 = vld [vmem:[%s5430_s23 + $0xa] sm:$0x3f] }
  0x16   : > { %v369_v17 = vcombine.high %v361_v13, %v361_v13  ;;  %v764_v25 = vcombine.low %v5449_v15, %v5449_v15  ;;  %v510_v26 = vcombine.low %v361_v13, %v361_v13  ;;  %v371_v32 = vcombine.low %v351_v29, %v351_v29  ;;  %v674_v46 = vld [vmem:[%s5430_s23 + $0xc] sm:$0x3f] }
  0x17   : > { %598 = vst [vmem:[#allocation3 + $0x38] sm:$0x3] %v5459_v19  ;;  %v440_v20 = vcombine.low %v5452_v16, %v5452_v16  ;;  %v622_v22 = vcombine.high %v614_v21, %v614_v21  ;;  %v693_v24 = vcombine.low %v5471_v23, %v5471_v23  ;;  %v763_v27 = vcombine.low %v614_v21, %v614_v21  ;;  %v745_v47 = vld [vmem:[%s5430_s23 + $0xc] sm:$0x3f] }
  0x18   : > { %533 = vrot.lane.b32.xlu1 %v439_v12, %s5373_s26  ;;  %319 = vrot.lane.b32.xlu0 %v5446_v14, %s5374_s27  ;;  %v300_v31 = vcombine.high %v5452_v16, %v5452_v16  ;;  %v378_v38 = vrot.slane %v371_v32, %v5425_v5  ;;  %v448_v39 = vrot.slane %v421_v33, %v5425_v5  ;;  %v5091_v2 = vld.sshfl [vmem:[%s5430_s23 + $0xc] sm:$0x33 pattern:$0x76325410] }
  0x19   : > { %v512_v40 = vcombine.low %v492_v35, %v492_v35  ;;  %v582_v48 = vcombine.high %v5471_v23, %v5471_v23  ;;  %v631_v49 = vrot.slane %v624_v45, %v5425_v5  ;;  %v701_v50 = vrot.slane %v674_v46, %v5425_v5  ;;  %601 = vst [vmem:[#allocation3 + $0x50] sm:$0x3] %v5091_v2 }
  0x1a   : > { %v456_v41 = vcombine.low %v448_v39, %v448_v39  ;;  %v765_v51 = vcombine.low %v745_v47, %v745_v47  ;;  %v301_v55 = vcombine.high %v281_v28, %v281_v28  ;;  %v316_v57 = vcombine.high %v308_v30, %v308_v30 }
  0x1b   : > { %v519_v42 = vrot.slane %v512_v40, %v5425_v5  ;;  %600 = vst [vmem:[#allocation3 + $0x48] sm:$0x3] %v582_v48  ;;  %v709_v52 = vcombine.low %v701_v50, %v701_v50  ;;  %v441_v58 = vcombine.high %v421_v33, %v421_v33  ;;  %v385_v59 = vrot.slane %v351_v29, %v5425_v5 }
  0x1c   : > { %389 = vrot.lane.b32.xlu1 %v369_v17, %s5372_s25  ;;  %321 = vrot.lane.b32.xlu0 %v5452_v16, %s5374_s27  ;;  %v772_v53 = vrot.slane %v765_v51, %v5425_v5  ;;  %v315_v56 = vrot.slane %v301_v55, %v5425_v5  ;;  %v386_v60 = vcombine.high %v378_v38, %v378_v38 }
  0x1d   : > { %v527_v44 = vcombine.low %v519_v42, %v519_v42  ;;  %v455_v61 = vrot.slane %v441_v58, %v5425_v5  ;;  %v526_v63 = vrot.slane %v492_v35, %v5425_v5  ;;  %v694_v1 = vcombine.high %v674_v46, %v674_v46 }
  0x1e   : > { %v780_v54 = vcombine.low %v772_v53, %v772_v53  ;;  %v590_v4 = vcombine.high %v5091_v2, %v5091_v2  ;;  %v638_v6 = vrot.slane %v604_v43, %v5425_v5  ;;  %v639_v7 = vcombine.high %v631_v49, %v631_v49 }
  0x1f   : > { %v457_v62 = vcombine.low %v455_v61, %v455_v61  ;;  %v528_v0 = vcombine.low %v526_v63, %v526_v63  ;;  %v779_v10 = vrot.slane %v745_v47, %v5425_v5 }
  0x20   : > { %462 = vrot.lane.b32.xlu1 %v440_v20, %s5371_s24  ;;  %531 = vrot.lane.b32.xlu0 %v361_v13, %s5373_s26  ;;  %602 = vst [vmem:[#allocation3 + $0x58] sm:$0x3] %v590_v4 }
  0x21   : > { %v781_v11 = vcombine.low %v779_v10, %v779_v10 }
  0x24   : > { %644 = vrot.lane.b32.xlu1 %v5449_v15, %s5375_s28  ;;  %642 = vrot.lane.b32.xlu0 %v622_v22, %s5375_s28 }
  0x28   : > { %715 = vrot.lane.b32.xlu1 %v693_v24, %s5376_s29  ;;  %713 = vrot.lane.b32.xlu0 %v5449_v15, %s5376_s29 }
  0x2c   : > { %786 = vrot.lane.b32.xlu1 %v764_v25, %s5377_s30  ;;  %784 = vrot.lane.b32.xlu0 %v614_v21, %s5377_s30 }
  0x30   : > { %387 = vrot.lane.b32.xlu1 %v361_v13, %s5372_s25  ;;  %317 = vrot.lane.b32.xlu0 %v5435_v8, %s5374_s27 }
  0x34   : > { %529 = vrot.lane.b32.xlu1 %v510_v26, %s5373_s26  ;;  %458 = vrot.lane.b32.xlu0 %v439_v12, %s5371_s24  ;;  %v816_v12 = vld [vmem:[%s5430_s23 + $0xc] sm:$0x3f] }
  0x35   : > { %v843_v13 = vrot.slane %v816_v12, %v5425_v5 }
  0x38   : > { %711 = vrot.lane.b32.xlu1 %v764_v25, %s5376_s29  ;;  %640 = vrot.lane.b32.xlu0 %v614_v21, %s5375_s28 }
  0x3c   : > { %854 = vrot.lane.b32.xlu1 %v5459_v19, %s5378_s6  ;;  %782 = vrot.lane.b32.xlu0 %v763_v27, %s5377_s30 }
  0x40   : > { %852 = vrot.lane.b32.xlu1 %v5449_v15, %s5378_s6  ;;  %856 = vrot.lane.b32.xlu0 %v5471_v23, %s5378_s6 }
  0x44   : > { %325 = vrot.lane.b32.xlu1 %v308_v30, %s5374_s27  ;;  %323 = vrot.lane.b32.xlu0 %v300_v31, %s5374_s27 }
  0x48   : > { %395 = vrot.lane.b32.xlu1 %v378_v38, %s5372_s25  ;;  %393 = vrot.lane.b32.xlu0 %v5446_v14, %s5372_s25  ;;  %v836_v14 = vcombine.high %v816_v12, %v816_v12 }
  0x4c   : > { %466 = vrot.lane.b32.xlu1 %v456_v41, %s5371_s24  ;;  %464 = vrot.lane.b32.xlu0 %v5452_v16, %s5371_s24  ;;  %v851_v16 = vcombine.high %v843_v13, %v843_v13 }
  0x50   : > { %537 = vrot.lane.b32.xlu1 %v527_v44, %s5373_s26  ;;  %535 = vrot.lane.b32.xlu0 %v5435_v8, %s5373_s26  ;;  %v708_v8 = vrot.slane %v694_v1, %v5425_v5 }
  0x52   : > { %v710_v9 = vcombine.low %v708_v8, %v708_v8 }
  0x54   : > { %648 = vrot.lane.b32.xlu1 %v631_v49, %s5375_s28  ;;  %646 = vrot.lane.b32.xlu0 %v5459_v19, %s5375_s28 }
  0x58   : > { %719 = vrot.lane.b32.xlu1 %v709_v52, %s5376_s29  ;;  %717 = vrot.lane.b32.xlu0 %v5471_v23, %s5376_s29 }
  0x5c   : > { %790 = vrot.lane.b32.xlu1 %v780_v54, %s5377_s30  ;;  %788 = vrot.lane.b32.xlu0 %v5449_v15, %s5377_s30  ;;  %v850_v15 = vrot.slane %v836_v14, %v5425_v5 }
  0x60   : > { %329 = vrot.lane.b32.xlu1 %v315_v56, %s5374_s27  ;;  %327 = vrot.lane.b32.xlu0 %v316_v57, %s5374_s27 }
  0x64   : > { %399 = vrot.lane.b32.xlu1 %v385_v59, %s5372_s25  ;;  %397 = vrot.lane.b32.xlu0 %v386_v60, %s5372_s25 }
  0x68   : > { %470 = vrot.lane.b32.xlu1 %v457_v62, %s5371_s24  ;;  %468 = vrot.lane.b32.xlu0 %v448_v39, %s5371_s24 }
  0x6c   : > { %541 = vrot.lane.b32.xlu1 %v528_v0, %s5373_s26  ;;  %539 = vrot.lane.b32.xlu0 %v519_v42, %s5373_s26 }
  0x70   : > { %652 = vrot.lane.b32.xlu1 %v638_v6, %s5375_s28  ;;  %650 = vrot.lane.b32.xlu0 %v639_v7, %s5375_s28 }
  0x74   : > { %723 = vrot.lane.b32.xlu1 %v710_v9, %s5376_s29  ;;  %721 = vrot.lane.b32.xlu0 %v701_v50, %s5376_s29  ;;  %v885_v50 = vld [vmem:[%s264_s13] sm:$0x3] }
  0x75   : > { %v906_v56 = vsel %vm904_vm0, %v885_v50, 0 }
  0x76   : > { %v5622_v59 = vand.u32 4294901760, %v906_v56 }
  0x78   : > { %794 = vrot.lane.b32.xlu1 %v781_v11, %s5377_s30  ;;  %792 = vrot.lane.b32.xlu0 %v772_v53, %s5377_s30  ;;  %v5630_v4 = vsub.f32 %v906_v56, %v5622_v59 }
  0x7c   : > { %860 = vrot.lane.b32.xlu1 %v843_v13, %s5378_s6  ;;  %858 = vrot.lane.b32.xlu0 %v582_v48, %s5378_s6  ;;  %v5642_v13 = vand.u32 4294901760, %v5630_v4 }
  0x80   : > { %864 = vrot.lane.b32.xlu1 %v850_v15, %s5378_s6  ;;  %862 = vrot.lane.b32.xlu0 %v851_v16, %s5378_s6 }
  0x86   : > { %v461_v17 = vpop.permute.xlu0 %460  ;;  %v5579_v18 = vpop.permute.xlu1 %391 }
  0x8a   : > { %v5581_v19 = vpop.permute.xlu1 %533  ;;  %v320_v20 = vpop.permute.xlu0 %319 }
  0x8e   : > { %v390_v21 = vpop.permute.xlu1 %389  ;;  %v5583_v22 = vpop.permute.xlu0 %321 }
  0x8f   : > { %v403_v23 = vsel %vm401_vm1, %v390_v21, %v5579_v18  ;;  %v333_v24 = vsel %vm331_vm2, %v320_v20, %v5583_v22 }
  0x90   : > { %415 = vst [vmem:[#allocation3 + $0x8] sm:$0xc] %v403_v23  ;;  %345 = vst [vmem:[#allocation3 + $0x8] sm:$0x3] %v333_v24 }
  0x92   : > { %v5589_v25 = vpop.permute.xlu1 %462  ;;  %v532_v26 = vpop.permute.xlu0 %531 }
  0x93   : > { %v474_v27 = vsel %vm472_vm3, %v461_v17, %v5589_v25  ;;  %v545_v28 = vsel %vm543_vm4, %v532_v26, %v5581_v19 }
  0x94   : > { %486 = vst [vmem:[#allocation3 + $0x8] sm:$0x30] %v474_v27  ;;  %557 = vst [vmem:[#allocation3 + $0x8] sm:$0xc0] %v545_v28  ;;  %v1001_v27 = vsub.f32 %v5630_v4, %v5642_v13 }
  0x96   : > { %v5595_v29 = vpop.permute.xlu1 %644  ;;  %v643_v30 = vpop.permute.xlu0 %642 }
  0x97   : > { %v656_v31 = vsel %vm654_vm5, %v643_v30, %v5595_v29 }
  0x98   : > { %668 = vst [vmem:[#allocation3 + $0x38] sm:$0xc] %v656_v31 }
  0x9a   : > { %v5599_v32 = vpop.permute.xlu1 %715  ;;  %v714_v33 = vpop.permute.xlu0 %713 }
  0x9b   : > { %v727_v35 = vsel %vm725_vm6, %v714_v33, %v5599_v32  ;;  %v887_v44 = vld [vmem:[#allocation3 + $0x8] sm:$0xff] }
  0x9c   : > { %739 = vst [vmem:[#allocation3 + $0x38] sm:$0x30] %v727_v35  ;;  %v927_v51 = vand.u32 4294901760, %v887_v44 }
  0x9e   : > { %v5603_v36 = vpop.permute.xlu1 %786  ;;  %v785_v38 = vpop.permute.xlu0 %784  ;;  %v5626_v63 = vsub.f32 %v887_v44, %v927_v51 }
  0x9f   : > { %v798_v39 = vsel %vm796_vm7, %v785_v38, %v5603_v36 }
  0xa0   : > { %810 = vst [vmem:[#allocation3 + $0x38] sm:$0xc0] %v798_v39  ;;  %v1011_v11 = vand.u32 4294901760, %v5626_v63 }
  0xa2   : > { %v388_v40 = vpop.permute.xlu1 %387  ;;  %v318_v41 = vpop.permute.xlu0 %317  ;;  %v1012_v23 = vsub.f32 %v5626_v63, %v1011_v11 }
  0xa3   : > { %v402_v42 = vsel %vm401_vm1, %v388_v40, %v390_v21  ;;  %v332_v43 = vsel %vm331_vm2, %v318_v41, %v320_v20 }
  0xa4   : > { %414 = vst [vmem:[#allocation3] sm:$0xc] %v402_v42  ;;  %344 = vst [vmem:[#allocation3] sm:$0x3] %v332_v43  ;;  %v1013_v41 = vand.u32 4294901760, %v1012_v23 }
  0xa6   : > { %v530_v45 = vpop.permute.xlu1 %529  ;;  %v459_v46 = vpop.permute.xlu0 %458 }
  0xa7   : > { %v544_v47 = vsel %vm543_vm4, %v530_v45, %v532_v26  ;;  %v473_v48 = vsel %vm472_vm3, %v459_v46, %v461_v17  ;;  %v893_v49 = vld [vmem:[#allocation3 + $0x38] sm:$0xff] }
  0xa8   : > { %556 = vst [vmem:[#allocation3] sm:$0xc0] %v544_v47  ;;  %485 = vst [vmem:[#allocation3] sm:$0x30] %v473_v48  ;;  %v931_v52 = vand.u32 4294901760, %v893_v49  ;;  %v5680_v47 = vand.u32 4294901760, %v1001_v27 }
  0xaa   : > { %v712_v53 = vpop.permute.xlu1 %711  ;;  %v641_v54 = vpop.permute.xlu0 %640  ;;  %v5616_v55 = vpack.c.bf16 %v931_v52, %v927_v51  ;;  %v5624_v60 = vsub.f32 %v893_v49, %v931_v52 }
  0xab   : > { %v726_v57 = vsel %vm725_vm6, %v712_v53, %v714_v33  ;;  %v655_v58 = vsel %vm654_vm5, %v641_v54, %v643_v30 }
  0xac   : > { %738 = vst [vmem:[#allocation3 + $0x30] sm:$0x30] %v726_v57  ;;  %667 = vst [vmem:[#allocation3 + $0x30] sm:$0xc] %v655_v58  ;;  %5107 = vmatprep.subr.bf16.mxu0 %v5616_v55  ;;  %v1023_v8 = vand.u32 4294901760, %v5624_v60  ;;  %v5114_v23 = vpack.c.bf16 %v5624_v60, %v5626_v63 }
  0xae   : > { %v855_v61 = vpop.permute.xlu1 %854  ;;  %v783_v62 = vpop.permute.xlu0 %782  ;;  %v1024_v16 = vsub.f32 %v5624_v60, %v1023_v8 }
  0xaf   : > { %v797_v0 = vsel %vm796_vm7, %v783_v62, %v785_v38  ;;  %v886_v1 = vld [vmem:[#allocation3] sm:$0xff] }
  0xb0   : > { %809 = vst [vmem:[#allocation3 + $0x30] sm:$0xc0] %v797_v0  ;;  %v929_v2 = vand.u32 4294901760, %v886_v1  ;;  %v1025_v33 = vand.u32 4294901760, %v1024_v16 }
  0xb2   : > { %v853_v6 = vpop.permute.xlu1 %852  ;;  %v5632_v7 = vpop.permute.xlu0 %856  ;;  %v5639_v12 = vsub.f32 %v886_v1, %v929_v2  ;;  %v5110_v50 = vpack.c.bf16 %v1025_v33, %v1013_v41 }
  0xb3   : > { %v867_v9 = vsel %vm866_vm8, %v853_v6, %v855_v61  ;;  %v868_v10 = vsel %vm866_vm8, %v855_v61, %v5632_v7 }
  0xb4   : > { %879 = vst [vmem:[#allocation3 + $0x60] sm:$0x3] %v867_v9  ;;  %880 = vst [vmem:[#allocation3 + $0x68] sm:$0x3] %v868_v10  ;;  %v1017_v26 = vand.u32 4294901760, %v5639_v12 }
  0xb6   : > { %v5644_v14 = vpop.permute.xlu1 %325  ;;  %v324_v15 = vpop.permute.xlu0 %323  ;;  %v1018_v44 = vsub.f32 %v5639_v12, %v1017_v26 }
  0xb7   : > { %v334_v17 = vsel %vm331_vm2, %v5583_v22, %v324_v15  ;;  %v335_v20 = vsel %vm331_vm2, %v324_v15, %v5644_v14  ;;  %v892_v21 = vld [vmem:[#allocation3 + $0x30] sm:$0xff] }
  0xb8   : > { %346 = vst [vmem:[#allocation3 + $0x10] sm:$0x3] %v334_v17  ;;  %347 = vst [vmem:[#allocation3 + $0x18] sm:$0x3] %v335_v20  ;;  %v933_v24 = vand.u32 4294901760, %v892_v21  ;;  %v1019_v57 = vand.u32 4294901760, %v1018_v44 }
  0xba   : > { %v5659_v28 = vpop.permute.xlu1 %395  ;;  %v394_v22 = vpop.permute.xlu0 %393  ;;  %v5661_v30 = vpack.c.bf16 %v933_v24, %v929_v2  ;;  %v5663_v31 = vsub.f32 %v892_v21, %v933_v24 }
  0xbb   : > { %v404_v35 = vsel %vm401_vm1, %v5579_v18, %v394_v22  ;;  %v405_v38 = vsel %vm401_vm1, %v394_v22, %v5659_v28  ;;  %v899_v39 = vld [vmem:[#allocation3 + $0x68] sm:$0x3]  ;;  %v898_v40 = vld [vmem:[#allocation3 + $0x60] sm:$0x3] }
  0xbc   : > { %416 = vst [vmem:[#allocation3 + $0x10] sm:$0xc] %v404_v35  ;;  %417 = vst [vmem:[#allocation3 + $0x18] sm:$0xc] %v405_v38  ;;  %5109 = vmatpush1.bf16.msra.mxu0 %v5661_v30  ;;  %v913_v42 = vsel %vm908_vm9, %v899_v39, 0  ;;  %v910_v43 = vsel %vm908_vm9, %v898_v40, 0  ;;  %v5116_v24 = vpack.c.bf16 %v5663_v31, %v5639_v12 }
  0xbd   : > { %v1029_v18 = vand.u32 4294901760, %v5663_v31  ;;  %v5676_v45 = vand.u32 4294901760, %v913_v42  ;;  %v5678_v46 = vand.u32 4294901760, %v910_v43 }
  0xbe   : > { %v5682_v48 = vpop.permute.xlu1 %466  ;;  %v465_v49 = vpop.permute.xlu0 %464 }
  0xbf   : > { %v1030_v51 = vsub.f32 %v5663_v31, %v1029_v18  ;;  %v475_v52 = vsel %vm472_vm3, %v5589_v25, %v465_v49  ;;  %v476_v53 = vsel %vm472_vm3, %v465_v49, %v5682_v48  ;;  %936 = vmatprep.subr.mxu0 %v5676_v45  ;;  %v5693_v54 = vsub.f32 %v910_v43, %v5678_v46 }
  0xc0   : > { %v5696_v56 = vsub.f32 %v913_v42, %v5676_v45  ;;  %487 = vst [vmem:[#allocation3 + $0x10] sm:$0x30] %v475_v52  ;;  %488 = vst [vmem:[#allocation3 + $0x18] sm:$0x30] %v476_v53  ;;  %938 = vmatpush1.msra.mxu0 %v5678_v46  ;;  %v5122_v43 = vpack.c.bf16 %v1023_v8, %v1011_v11  ;;  %v5124_v63 = vpack.c.bf16 %v1029_v18, %v1017_v26 }
  0xc1   : > { %v1031_v58 = vand.u32 4294901760, %v1030_v51  ;;  %1003 = vmatmul.mubr.f32.vlgmr.msra.gmra.mrb[0].mxu0 %v5680_v47  ;;  %5111 = vmatprep.subr.bf16.mxu0 %v5110_v50  ;;  %v1041_v61 = vand.u32 4294901760, %v5693_v54 }
  0xc2   : > { %v1035_v25 = vand.u32 4294901760, %v5696_v56  ;;  %v5702_v62 = vpop.permute.xlu1 %537  ;;  %v536_v0 = vpop.permute.xlu0 %535  ;;  %1103 = vmatprep.mubr.f32.mxu0 %v5379_v34 }
  0xc3   : > { %v5112_v1 = vpack.c.bf16 %v1031_v58, %v1019_v57  ;;  %v546_v2 = vsel %vm543_vm4, %v5581_v19, %v536_v0  ;;  %v547_v6 = vsel %vm543_vm4, %v536_v0, %v5702_v62  ;;  %v1042_v10 = vsub.f32 %v5693_v54, %v1041_v61 }
  0xc4   : > { %v1036_v9 = vsub.f32 %v5696_v56, %v1035_v25  ;;  %558 = vst [vmem:[#allocation3 + $0x10] sm:$0xc0] %v546_v2  ;;  %559 = vst [vmem:[#allocation3 + $0x18] sm:$0xc0] %v547_v6 }
  0xc5   : > { %5113 = vmatpush1.bf16.msra.mxu0 %v5112_v1  ;;  %v1043_v16 = vand.u32 4294901760, %v1042_v10 }
  0xc6   : > { %v1037_v15 = vand.u32 4294901760, %v1036_v9  ;;  %v5715_v17 = vpop.permute.xlu1 %648  ;;  %v647_v20 = vpop.permute.xlu0 %646 }
  0xc7   : > { %v657_v19 = vsel %vm654_vm5, %v5595_v29, %v647_v20  ;;  %v658_v21 = vsel %vm654_vm5, %v647_v20, %v5715_v17 }
  0xc8   : > { %1038 = vmatprep.subr.mxu0 %v1037_v15  ;;  %669 = vst [vmem:[#allocation3 + $0x40] sm:$0xc] %v657_v19  ;;  %670 = vst [vmem:[#allocation3 + $0x48] sm:$0xc] %v658_v21 }
  0xc9   : > { %1044 = vmatpush1.msra.mxu0 %v1043_v16 }
  0xca   : > { %1105 = vmatmul.mubr.f32.vlgmr.msra.gmra.mrb[0].mxu0 %v5622_v59  ;;  %5115 = vmatprep.subr.bf16.mxu0 %v5114_v23  ;;  %v5726_v27 = vpop.permute.xlu1 %719  ;;  %v718_v22 = vpop.permute.xlu0 %717 }
  0xcb   : > { %5117 = vmatpush1.bf16.msra.mxu0 %v5116_v24  ;;  %1187 = vmatprep.mubr.f32.mxu0 %v5379_v34  ;;  %v728_v29 = vsel %vm725_vm6, %v5599_v32, %v718_v22  ;;  %v729_v33 = vsel %vm725_vm6, %v718_v22, %v5726_v27  ;;  %v889_v44 = vld [vmem:[#allocation3 + $0x18] sm:$0xff]  ;;  %v5753_v49 = vld [vmem:[#allocation3 + $0x10] sm:$0xff] }
  0xcc   : > { %1125 = vmatprep.subr.mxu0 %v5696_v56  ;;  %740 = vst [vmem:[#allocation3 + $0x40] sm:$0x30] %v728_v29  ;;  %741 = vst [vmem:[#allocation3 + $0x48] sm:$0x30] %v729_v33  ;;  %v1444_v11 = vand.u32 4294901760, %v889_v44  ;;  %v1446_v57 = vand.u32 4294901760, %v5753_v49 }
  0xce   : > { %v5734_v35 = vpop.permute.xlu1 %790  ;;  %v789_v38 = vpop.permute.xlu0 %788  ;;  %v5797_v16 = vsub.f32 %v889_v44, %v1444_v11  ;;  %v5806_v24 = vsub.f32 %v5753_v49, %v1446_v57 }
  0xcf   : > { %1128 = vmatpush1.msra.mxu0 %v5693_v54  ;;  %v799_v39 = vsel %vm796_vm7, %v5603_v36, %v789_v38  ;;  %v800_v40 = vsel %vm796_vm7, %v789_v38, %v5734_v35 }
  0xd0   : > { %5119 = vmatprep.subr.bf16.mxu0 %v5616_v55  ;;  %811 = vst [vmem:[#allocation3 + $0x40] sm:$0xc0] %v799_v39  ;;  %812 = vst [vmem:[#allocation3 + $0x48] sm:$0xc0] %v800_v40  ;;  %v1528_v38 = vand.u32 4294901760, %v5797_v16 }
  0xd2   : > { %1190 = vmatmul.mubr.f32.vlgmr.msra.gmra.mrb[0].mxu0 %v5630_v4  ;;  %v330_v32 = vpop.permute.xlu1 %329  ;;  %v328_v41 = vpop.permute.xlu0 %327 }
  0xd3   : > { %5121 = vmatpush1.bf16.msra.mxu0 %v5661_v30  ;;  %1266 = vmatprep.mubr.f32.mxu0 %v5379_v34  ;;  %v336_v42 = vsel %vm331_vm2, %v5644_v14, %v328_v41  ;;  %v337_v36 = vsel %vm331_vm2, %v328_v41, %v330_v32 }
  0xd4   : > { %1205 = vmatprep.subr.mxu0 %v5676_v45  ;;  %348 = vst [vmem:[#allocation3 + $0x20] sm:$0x3] %v336_v42  ;;  %349 = vst [vmem:[#allocation3 + $0x28] sm:$0x3] %v337_v36  ;;  %v1534_v36 = vand.u32 4294901760, %v5806_v24 }
  0xd6   : > { %v400_v50 = vpop.permute.xlu1 %399  ;;  %v398_v51 = vpop.permute.xlu0 %397 }
  0xd7   : > { %1207 = vmatpush1.msra.mxu0 %v5678_v46  ;;  %v406_v14 = vsel %vm401_vm1, %v5659_v28, %v398_v51  ;;  %v407_v52 = vsel %vm401_vm1, %v398_v51, %v400_v50  ;;  %v895_v60 = vld [vmem:[#allocation3 + $0x48] sm:$0xff]  ;;  %v894_v8 = vld [vmem:[#allocation3 + $0x40] sm:$0xff] }
  0xd8   : > { %5123 = vmatprep.subr.bf16.mxu0 %v5122_v43  ;;  %418 = vst [vmem:[#allocation3 + $0x20] sm:$0xc] %v406_v14  ;;  %419 = vst [vmem:[#allocation3 + $0x28] sm:$0xc] %v407_v52  ;;  %v1448_v53 = vand.u32 4294901760, %v895_v60  ;;  %v1450_v58 = vand.u32 4294901760, %v894_v8 }
  0xda   : > { %1270 = vmatmul.mubr.f32.vlgmr.msra.gmra.mrb[0].mxu0 %v5642_v13  ;;  %v471_v28 = vpop.permute.xlu1 %470  ;;  %v469_v0 = vpop.permute.xlu0 %468  ;;  %v5765_v1 = vpack.c.bf16 %v1448_v53, %v1444_v11  ;;  %v5767_v12 = vpack.c.bf16 %v1450_v58, %v1446_v57  ;;  %v5794_v15 = vsub.f32 %v895_v60, %v1448_v53  ;;  %v1535_v53 = vsub.f32 %v5806_v24, %v1534_v36 }
  0xdb   : > { %5125 = vmatpush1.bf16.msra.mxu0 %v5124_v63  ;;  %v477_v26 = vsel %vm472_vm3, %v5682_v48, %v469_v0  ;;  %v478_v31 = vsel %vm472_vm3, %v469_v0, %v471_v28  ;;  %1358 = vmatprep.mubr.f32.mxu0 %v5379_v34 }
  0xdc   : > { %1295 = vmatprep.subr.mxu0 %v1035_v25  ;;  %489 = vst [vmem:[#allocation3 + $0x20] sm:$0x30] %v477_v26  ;;  %490 = vst [vmem:[#allocation3 + $0x28] sm:$0x30] %v478_v31  ;;  %5131 = vmatprep.subr.bf16.mxu1 %v5765_v1  ;;  %v1540_v22 = vand.u32 4294901760, %v5794_v15 }
  0xdd   : > { %5133 = vmatpush1.bf16.msra.mxu1 %v5767_v12 }
  0xde   : > { %v542_v18 = vpop.permute.xlu1 %541  ;;  %v540_v2 = vpop.permute.xlu0 %539  ;;  %v1541_v42 = vsub.f32 %v5794_v15, %v1540_v22 }
  0xdf   : > { %1299 = vmatpush1.msra.mxu0 %v1041_v61  ;;  %v548_v48 = vsel %vm543_vm4, %v5702_v62, %v540_v2  ;;  %v549_v6 = vsel %vm543_vm4, %v540_v2, %v542_v18 }
  0xe0   : > { %5127 = vmatprep.subr.bf16.mxu0 %v5616_v55  ;;  %560 = vst [vmem:[#allocation3 + $0x20] sm:$0xc0] %v548_v48  ;;  %561 = vst [vmem:[#allocation3 + $0x28] sm:$0xc0] %v549_v6  ;;  %v1542_v11 = vand.u32 4294901760, %v1541_v42 }
  0xe2   : > { %1360 = vmatmul.mubr.f32.vlgmr.msra.gmra.mrb[0].mxu0 %v5622_v59  ;;  %v653_v56 = vpop.permute.xlu1 %652  ;;  %v651_v25 = vpop.permute.xlu0 %650 }
  0xe3   : > { %5129 = vmatpush1.bf16.msra.mxu0 %v5661_v30  ;;  %1436 = vmatprep.mubr.f32.mxu0 %v5379_v34  ;;  %v659_v54 = vsel %vm654_vm5, %v5715_v17, %v651_v25  ;;  %v660_v61 = vsel %vm654_vm5, %v651_v25, %v653_v56 }
  0xe4   : > { %1375 = vmatprep.subr.mxu0 %v5676_v45  ;;  %671 = vst [vmem:[#allocation3 + $0x50] sm:$0xc] %v659_v54  ;;  %672 = vst [vmem:[#allocation3 + $0x58] sm:$0xc] %v660_v61 }
  0xe6   : > { %v724_v55 = vpop.permute.xlu1 %723  ;;  %v722_v62 = vpop.permute.xlu0 %721 }
  0xe7   : > { %1377 = vmatpush1.msra.mxu0 %v5678_v46  ;;  %v730_v30 = vsel %vm725_vm6, %v5726_v27, %v722_v62  ;;  %v731_v9 = vsel %vm725_vm6, %v722_v62, %v724_v55  ;;  %v891_v10 = vld [vmem:[#allocation3 + $0x28] sm:$0xff]  ;;  %v890_v20 = vld [vmem:[#allocation3 + $0x20] sm:$0xff]  ;;  %v5800_v46 = vsub.f32 %v894_v8, %v1450_v58 }
  0xe8   : > { %742 = vst [vmem:[#allocation3 + $0x50] sm:$0x30] %v730_v30  ;;  %743 = vst [vmem:[#allocation3 + $0x58] sm:$0x30] %v731_v9  ;;  %v1961_v23 = vand.u32 4294901760, %v891_v10  ;;  %v1963_v27 = vand.u32 4294901760, %v890_v20 }
  0xe9   : > { %v1546_v32 = vand.u32 4294901760, %v5800_v46  ;;  %v1536_v30 = vand.u32 4294901760, %v1535_v53 }
  0xea   : > { %1438 = vmatmul.mubr.f32.vlgmr.msra.gmra.mrb[0].mxu0 %v5622_v59  ;;  %v795_v45 = vpop.permute.xlu1 %794  ;;  %v793_v17 = vpop.permute.xlu0 %792  ;;  %v5813_v40 = vsub.f32 %v891_v10, %v1961_v23  ;;  %v5816_v41 = vsub.f32 %v890_v20, %v1963_v27 }
  0xeb   : > { %2031 = vmatprep.mubr.f32.mxu0 %v5379_v34  ;;  %v801_v19 = vsel %vm796_vm7, %v5734_v35, %v793_v17  ;;  %v802_v21 = vsel %vm796_vm7, %v793_v17, %v795_v45  ;;  %v1547_v52 = vsub.f32 %v5800_v46, %v1546_v32 }
  0xec   : > { %813 = vst [vmem:[#allocation3 + $0x50] sm:$0xc0] %v801_v19  ;;  %814 = vst [vmem:[#allocation3 + $0x58] sm:$0xc0] %v802_v21  ;;  %v2045_v63 = vand.u32 4294901760, %v5813_v40  ;;  %v2051_v57 = vand.u32 4294901760, %v5816_v41 }
  0xed   : > { %v1548_v48 = vand.u32 4294901760, %v1547_v52 }
  0xee   : > { %v861_v29 = vpop.permute.xlu1 %860  ;;  %v859_v33 = vpop.permute.xlu0 %858  ;;  %v2046_v6 = vsub.f32 %v5813_v40, %v2045_v63  ;;  %v2052_v45 = vsub.f32 %v5816_v41, %v2051_v57 }
  0xef   : > { %v869_v39 = vsel %vm866_vm8, %v5632_v7, %v859_v33  ;;  %v870_v35 = vsel %vm866_vm8, %v859_v33, %v861_v29  ;;  %v1529_v7 = vsub.f32 %v5797_v16, %v1528_v38  ;;  %v5136_v19 = vpack.c.bf16 %v1548_v48, %v1536_v30 }
  0xf0   : > { %881 = vst [vmem:[#allocation3 + $0x70] sm:$0x3] %v869_v39  ;;  %882 = vst [vmem:[#allocation3 + $0x78] sm:$0x3] %v870_v35  ;;  %v5138_v48 = vpack.c.bf16 %v5794_v15, %v5797_v16 }
  0xf1   : > { %v1530_v2 = vand.u32 4294901760, %v1529_v7 }
  0xf2   : > { %v865_v43 = vpop.permute.xlu1 %864  ;;  %v863_v44 = vpop.permute.xlu0 %862 }
  0xf3   : > { %v871_v49 = vsel %vm866_vm8, %v861_v29, %v863_v44  ;;  %v872_v50 = vsel %vm866_vm8, %v863_v44, %v865_v43  ;;  %v897_v51 = vld [vmem:[#allocation3 + $0x58] sm:$0xff]  ;;  %v896_v14 = vld [vmem:[#allocation3 + $0x50] sm:$0xff]  ;;  %v5134_v9 = vpack.c.bf16 %v1542_v11, %v1530_v2 }
  0xf4   : > { %883 = vst [vmem:[#allocation3 + $0x80] sm:$0x3] %v871_v49  ;;  %884 = vst [vmem:[#allocation3 + $0x88] sm:$0x3] %v872_v50  ;;  %v1965_v60 = vand.u32 4294901760, %v897_v51  ;;  %v1967_v8 = vand.u32 4294901760, %v896_v14 }
  0xf6   : > { %v5835_v58 = vpack.c.bf16 %v1965_v60, %v1961_v23  ;;  %v5837_v28 = vsub.f32 %v897_v51, %v1965_v60  ;;  %v5839_v0 = vpack.c.bf16 %v1967_v8, %v1963_v27  ;;  %v5841_v26 = vsub.f32 %v896_v14, %v1967_v8 }
  0xf7   : > { %v901_v31 = vld [vmem:[#allocation3 + $0x78] sm:$0x3]  ;;  %v900_v18 = vld [vmem:[#allocation3 + $0x70] sm:$0x3]  ;;  %v2047_v27 = vand.u32 4294901760, %v2046_v6  ;;  %v2053_v51 = vand.u32 4294901760, %v2052_v45  ;;  %v5146_v45 = vpack.c.bf16 %v1540_v22, %v1528_v38 }
  0xf8   : > { %5155 = vmatprep.subr.bf16.mxu0 %v5835_v58  ;;  %v919_v56 = vsel %vm908_vm9, %v901_v31, 0  ;;  %v916_v25 = vsel %vm908_vm9, %v900_v18, 0  ;;  %v2057_v54 = vand.u32 4294901760, %v5837_v28  ;;  %v2063_v61 = vand.u32 4294901760, %v5841_v26 }
  0xf9   : > { %5157 = vmatpush1.bf16.msra.mxu0 %v5839_v0  ;;  %v5852_v55 = vand.u32 4294901760, %v919_v56  ;;  %v5854_v62 = vand.u32 4294901760, %v916_v25 }
  0xfa   : > { %v2058_v10 = vsub.f32 %v5837_v28, %v2057_v54  ;;  %v2064_v17 = vsub.f32 %v5841_v26, %v2063_v61  ;;  %v5172_v15 = vpack.c.bf16 %v2063_v61, %v2051_v57 }
  0xfb   : > { %1453 = vmatprep.subr.mxu1 %v5852_v55  ;;  %v5867_v20 = vsub.f32 %v916_v25, %v5854_v62  ;;  %v903_v21 = vld [vmem:[#allocation3 + $0x88] sm:$0x3]  ;;  %v902_v23 = vld [vmem:[#allocation3 + $0x80] sm:$0x3]  ;;  %v5870_v29 = vsub.f32 %v919_v56, %v5852_v55 }
  0xfc   : > { %1455 = vmatpush1.msra.mxu1 %v5854_v62  ;;  %v925_v33 = vsel %vm908_vm9, %v903_v21, 0  ;;  %v922_v39 = vsel %vm908_vm9, %v902_v23, 0  ;;  %v2059_v35 = vand.u32 4294901760, %v2058_v10  ;;  %v2065_v42 = vand.u32 4294901760, %v2064_v17 }
  0xfd   : > { %1520 = vmatmul.mubr.f32.vlgmr.msra.gmra.mrb[0].mxu1 %v5680_v47  ;;  %5135 = vmatprep.subr.bf16.mxu1 %v5134_v9  ;;  %v5876_v43 = vand.u32 4294901760, %v925_v33  ;;  %v5878_v44 = vand.u32 4294901760, %v922_v39  ;;  %v1552_v7 = vand.u32 4294901760, %v5870_v29  ;;  %v1558_v49 = vand.u32 4294901760, %v5867_v20 }
  0xfe   : > { %5137 = vmatpush1.bf16.msra.mxu1 %v5136_v19  ;;  %v5158_v50 = vpack.c.bf16 %v2059_v35, %v2047_v27  ;;  %1620 = vmatprep.mubr.f32.mxu1 %v5379_v34  ;;  %v5160_v11 = vpack.c.bf16 %v2065_v42, %v2053_v51  ;;  %v5162_v9 = vpack.c.bf16 %v5837_v28, %v5813_v40 }
  0xff   : > { %1970 = vmatprep.subr.mxu0 %v5876_v43  ;;  %v5885_v14 = vsub.f32 %v922_v39, %v5878_v44  ;;  %v1553_v52 = vsub.f32 %v5870_v29, %v1552_v7  ;;  %v1559_v60 = vsub.f32 %v5867_v20, %v1558_v49  ;;  %v2068_v8 = vsub.f32 %v925_v33, %v5876_v43 }
 0x100   : > { %1972 = vmatpush1.msra.mxu0 %v5878_v44  ;;  %v5164_v10 = vpack.c.bf16 %v5841_v26, %v5816_v41  ;;  %v5148_v17 = vpack.c.bf16 %v1546_v32, %v1534_v36  ;;  %v2492_v36 = vsub.s32 2, %v5421_v3 }
 0x101   : > { %2037 = vmatmul.mubr.f32.vlgmr.msra.gmra.mrb[2].mxu0 %v5680_v47  ;;  %5159 = vmatprep.subr.bf16.mxu0 %v5158_v50  ;;  %v1554_v53 = vand.u32 4294901760, %v1553_v52  ;;  %v1560_v31 = vand.u32 4294901760, %v1559_v60  ;;  %v2069_v18 = vand.u32 4294901760, %v2068_v8  ;;  %v2075_v2 = vand.u32 4294901760, %v5885_v14 }
 0x102   : > { %5161 = vmatpush1.bf16.msra.mxu0 %v5160_v11  ;;  %2137 = vmatprep.mubr.f32.mxu0 %v5379_v34  ;;  %v5140_v47 = vpack.c.bf16 %v5800_v46, %v5806_v24 }
 0x103   : > { %1555 = vmatprep.subr.mxu1 %v1554_v53  ;;  %v2070_v6 = vsub.f32 %v2068_v8, %v2069_v18  ;;  %v2076_v56 = vsub.f32 %v5885_v14, %v2075_v2 }
 0x104   : > { %1561 = vmatpush1.msra.mxu1 %v1560_v31 }
 0x105   : > { %1622 = vmatmul.mubr.f32.vlgmr.msra.gmra.mrb[0].mxu1 %v5622_v59  ;;  %5139 = vmatprep.subr.bf16.mxu1 %v5138_v48  ;;  %v2071_v25 = vand.u32 4294901760, %v2070_v6  ;;  %v2077_v30 = vand.u32 4294901760, %v2076_v56 }
 0x106   : > { %5141 = vmatpush1.bf16.msra.mxu1 %v5140_v47  ;;  %1704 = vmatprep.mubr.f32.mxu1 %v5379_v34 }
 0x107   : > { %1642 = vmatprep.subr.mxu1 %v5870_v29  ;;  %2072 = vmatprep.subr.mxu0 %v2071_v25 }
 0x108   : > { %2078 = vmatpush1.msra.mxu0 %v2077_v30 }
 0x109   : > { %2139 = vmatmul.mubr.f32.vlgmr.msra.gmra.mrb[2].mxu0 %v5622_v59  ;;  %5163 = vmatprep.subr.bf16.mxu0 %v5162_v9 }
 0x10a   : > { %1645 = vmatpush1.msra.mxu1 %v5867_v20  ;;  %5165 = vmatpush1.bf16.msra.mxu0 %v5164_v10 }
 0x10b   : > { %5143 = vmatprep.subr.bf16.mxu1 %v5765_v1  ;;  %2159 = vmatprep.subr.mxu0 %v2068_v8 }
 0x10c   : > { %2221 = vmatprep.mubr.f32.mxu0 %v5379_v34 }
 0x10d   : > { %1707 = vmatmul.mubr.f32.vlgmr.msra.gmra.mrb[0].mxu1 %v5630_v4 }
 0x10e   : > { %5145 = vmatpush1.bf16.msra.mxu1 %v5767_v12  ;;  %2162 = vmatpush1.msra.mxu0 %v5885_v14 }
 0x10f   : > { %1722 = vmatprep.subr.mxu1 %v5852_v55  ;;  %5167 = vmatprep.subr.bf16.mxu0 %v5835_v58 }
 0x110   : > { %1783 = vmatprep.mubr.f32.mxu1 %v5379_v34 }
 0x111   : > { %2224 = vmatmul.mubr.f32.vlgmr.msra.gmra.mrb[2].mxu0 %v5630_v4  ;;  %v5170_v4 = vpack.c.bf16 %v2057_v54, %v2045_v63  ;;  %v2496_v63 = vsub.s32 3, %v5421_v3 }
 0x112   : > { %1724 = vmatpush1.msra.mxu1 %v5854_v62  ;;  %5169 = vmatpush1.bf16.msra.mxu0 %v5839_v0 }
 0x113   : > { %5147 = vmatprep.subr.bf16.mxu1 %v5146_v45  ;;  %2239 = vmatprep.subr.mxu0 %v5876_v43 }
 0x114   : > { %2300 = vmatprep.mubr.f32.mxu0 %v5379_v34 }
 0x115   : > { %1787 = vmatmul.mubr.f32.vlgmr.msra.gmra.mrb[0].mxu1 %v5642_v13 }
 0x116   : > { %5149 = vmatpush1.bf16.msra.mxu1 %v5148_v17  ;;  %2241 = vmatpush1.msra.mxu0 %v5878_v44 }
 0x117   : > { %1812 = vmatprep.subr.mxu1 %v1552_v7  ;;  %5171 = vmatprep.subr.bf16.mxu0 %v5170_v4 }
 0x118   : > { %1875 = vmatprep.mubr.f32.mxu1 %v5379_v34 }
 0x119   : > { %2304 = vmatmul.mubr.f32.vlgmr.msra.gmra.mrb[2].mxu0 %v5642_v13  ;;  %v2484_v13 = vsub.s32 0, %v5421_v3 }
 0x11a   : > { %1816 = vmatpush1.msra.mxu1 %v1558_v49  ;;  %5173 = vmatpush1.bf16.msra.mxu0 %v5172_v15 }
 0x11b   : > { %5151 = vmatprep.subr.bf16.mxu1 %v5765_v1  ;;  %2329 = vmatprep.subr.mxu0 %v2069_v18  ;;  %v279_v1 = vld [vmem:[%s6563_s4] sm:$0x3f] }
 0x11c   : > { %2392 = vmatprep.mubr.f32.mxu0 %v5379_v34  ;;  %v5967_v16 = vrot.slane %v279_v1, %v2484_v13  ;;  %v5977_v57 = vrot.slane %v279_v1, %v2492_v36  ;;  %v5980_v28 = vrot.slane %v279_v1, %v2496_v63  ;;  %v2478_v63 = vld [vmem:[%s6011_s21] sm:$0x3] }
 0x11d   : > { %1877 = vmatmul.mubr.f32.vlgmr.msra.gmra.mrb[0].mxu1 %v5622_v59 }
 0x11e   : > { %5153 = vmatpush1.bf16.msra.mxu1 %v5767_v12  ;;  %2333 = vmatpush1.msra.mxu0 %v2075_v2  ;;  %v2488_v12 = vsub.s32 1, %v5421_v3 }
 0x11f   : > { %1892 = vmatprep.subr.mxu1 %v5852_v55  ;;  %5175 = vmatprep.subr.bf16.mxu0 %v5835_v58  ;;  %v2500_v58 = vsub.s32 4, %v5421_v3 }
 0x120   : > { %1953 = vmatprep.mubr.f32.mxu1 %v5379_v34  ;;  %v5969_v46 = vrot.slane %v279_v1, %v2488_v12 }
 0x121   : > { %2394 = vmatmul.mubr.f32.vlgmr.msra.gmra.mrb[2].mxu0 %v5622_v59  ;;  %v5984_v55 = vrot.slane %v279_v1, %v2500_v58 }
 0x122   : > { %1894 = vmatpush1.msra.mxu1 %v5854_v62  ;;  %5177 = vmatpush1.bf16.msra.mxu0 %v5839_v0  ;;  %v2504_v0 = vsub.s32 5, %v5421_v3 }
 0x123   : > { %2409 = vmatprep.subr.mxu0 %v5876_v43  ;;  %2470 = vmatprep.mubr.f32.mxu0 %v5379_v34 }
 0x124   : > { %v5987_v20 = vrot.slane %v279_v1, %v2504_v0 }
 0x125   : > { %1955 = vmatmul.mubr.f32.vlgmr.msra.gmra.mrb[0].mxu1 %v5622_v59 }
 0x126   : > { %2411 = vmatpush1.msra.mxu0 %v5878_v44  ;;  %3345 = vmatprep.mubr.f32.mxu1 %v5379_v34 }
 0x129   : > { %2472 = vmatmul.mubr.f32.vlgmr.msra.gmra.mrb[2].mxu0 %v5622_v59 }
 0x12a   : > { %3862 = vmatprep.mubr.f32.mxu0 %v5379_v34 }
 0x1bd   : > { %v1439_v24 = vpop.f32.mrb[0].mxu0 }
 0x1be   : > { %v2512_v22 = vmul.f32 %v5967_v16, %v1439_v24  ;;  %v1441_v38 = vpop.f32.mrb[1].mxu0 }
 0x1bf   : > { %v2513_v59 = vmul.f32 %v5969_v46, %v1441_v38 }
 0x1c0   : > { %v2518_v40 = vsel %vm908_vm9, %v2512_v22, 0.0 }
 0x1c1   : > { %v2519_v32 = vsel %vm908_vm9, %v2513_v59, 0.0  ;;  %v5380_v59 = vmov 0  }
 0x1c2   : > { %v2520_v41 = vadd.f32 %v2519_v32, %v2518_v40  ;;  %5331 = vset.pattern.permute.xlu0 %v5380_v59  ;;  %5332 = vset.pattern.permute.xlu1 %v5380_v59  ;;  %v5094_v40 = vld [vmem:[%s6011_s21 + $0x2] sm:$0x3] }
 0x1f8   : > { %v1956_v26 = vpop.f32.mrb[0].mxu1 }
 0x1f9   : > { %v2514_v54 = vmul.f32 %v5977_v57, %v1956_v26  ;;  %v1958_v61 = vpop.f32.mrb[1].mxu1 }
 0x1fa   : > { %v2515_v62 = vmul.f32 %v5980_v28, %v1958_v61 }
 0x1fb   : > { %v2521_v19 = vsel %vm908_vm9, %v2514_v54, 0.0 }
 0x1fc   : > { %v2522_v21 = vadd.f32 %v2521_v19, %v2520_v41  ;;  %v2523_v23 = vsel %vm908_vm9, %v2515_v62, 0.0  ;;  %v2473_v27 = vpop.f32.mrb[2].mxu0 }
 0x1fd   : > { %v2516_v29 = vmul.f32 %v5984_v55, %v2473_v27  ;;  %v2475_v33 = vpop.f32.mrb[3].mxu0 }
 0x1fe   : > { %v2524_v3 = vadd.f32 %v2523_v23, %v2522_v21  ;;  %v2517_v39 = vmul.f32 %v5987_v20, %v2475_v33 }
 0x1ff   : > { %v2525_v35 = vsel %vm908_vm9, %v2516_v29, 0.0 }
 0x200   : > { %v2526_v42 = vadd.f32 %v2525_v35, %v2524_v3  ;;  %v2527_v43 = vsel %vm908_vm9, %v2517_v39, 0.0 }
 0x202   : > { %v2528_v44 = vadd.f32 %v2527_v43, %v2526_v42 }
 0x204   : > { %2529 = vadd.xlane.f32.xlu0 %v2528_v44 }
 0x291   : > { %v2530_v7 = vpop.xlane.xlu0 %2529 }
 0x292   : > { %v2531_v49 = vmul.f32 0.001953125, %v2530_v7 }
 0x294   : > { %v2532_v50 = vsub.f32 %v1439_v24, %v2531_v49  ;;  %v2533_v51 = vsub.f32 %v1441_v38, %v2531_v49  ;;  %v2534_v14 = vsub.f32 %v1956_v26, %v2531_v49  ;;  %v2535_v52 = vsub.f32 %v1958_v61, %v2531_v49 }
 0x295   : > { %v2536_v60 = vsub.f32 %v2473_v27, %v2531_v49  ;;  %v2537_v8 = vsub.f32 %v2475_v33, %v2531_v49 }
 0x296   : > { %v2538_v11 = vmul.f32 %v2532_v50, %v5967_v16  ;;  %v2539_v53 = vmul.f32 %v2533_v51, %v5969_v46  ;;  %v2540_v31 = vmul.f32 %v2534_v14, %v5977_v57  ;;  %v2541_v18 = vmul.f32 %v2535_v52, %v5980_v28 }
 0x297   : > { %v2542_v2 = vmul.f32 %v2536_v60, %v5984_v55  ;;  %v2543_v47 = vmul.f32 %v2537_v8, %v5987_v20 }
 0x298   : > { %v2544_v48 = vmul.f32 %v2538_v11, %v2538_v11  ;;  %v2545_v6 = vmul.f32 %v2539_v53, %v2539_v53  ;;  %v2546_v56 = vmul.f32 %v2540_v31, %v2540_v31  ;;  %v2547_v25 = vmul.f32 %v2541_v18, %v2541_v18 }
 0x299   : > { %v2548_v45 = vmul.f32 %v2542_v2, %v2542_v2  ;;  %v2549_v15 = vmul.f32 %v2543_v47, %v2543_v47 }
 0x29a   : > { %v2550_v30 = vsel %vm908_vm9, %v2544_v48, 0.0  ;;  %v2551_v9 = vsel %vm908_vm9, %v2545_v6, 0.0  ;;  %v2553_v17 = vsel %vm908_vm9, %v2546_v56, 0.0  ;;  %v2555_v13 = vsel %vm908_vm9, %v2547_v25, 0.0 }
 0x29b   : > { %v2552_v10 = vadd.f32 %v2551_v9, %v2550_v30  ;;  %v2557_v12 = vsel %vm908_vm9, %v2548_v45, 0.0  ;;  %v2559_v22 = vsel %vm908_vm9, %v2549_v15, 0.0 }
 0x29d   : > { %v2554_v4 = vadd.f32 %v2553_v17, %v2552_v10 }
 0x29f   : > { %v2556_v1 = vadd.f32 %v2555_v13, %v2554_v4 }
 0x2a1   : > { %v2558_v24 = vadd.f32 %v2557_v12, %v2556_v1 }
 0x2a3   : > { %v2560_v38 = vadd.f32 %v2559_v22, %v2558_v24 }
 0x2a5   : > { %2561 = vadd.xlane.f32.xlu1 %v2560_v38 }
 0x2b6   : > { %2580 = vperm.xlu1 %5332, %v5094_v40  }
 0x332   : > { %v2562_v32 = vpop.xlane.xlu1 %2561 }
 0x333   : > { %v2563_v41 = vmul.f32 0.001953125, %v2562_v32 }
 0x335   : > { %v2564_v36 = vadd.f32 1e-05, %v2563_v41 }
 0x336   : > { %v2581_v54 = vpop.permute.xlu1 %2580 }
 0x337   : > { %5356 = vrsqrt.f32 %v2564_v36 }
 0x341   : > { %v5357_v58 = vpop.eup %5356 }
 0x342   : > { %v2566_v0 = vmul.f32 %v5357_v58, %v2478_v63 }
 0x344   : > { %2569 = vperm.xlu0 %5331, %v2566_v0  }
 0x3c3   : > { %v2570_v26 = vpop.permute.xlu0 %2569 }
 0x3c4   : > { %v2572_v61 = vmul.f32 %v2570_v26, %v2532_v50  ;;  %v2573_v62 = vmul.f32 %v2570_v26, %v2533_v51  ;;  %v2574_v19 = vmul.f32 %v2570_v26, %v2534_v14  ;;  %v2575_v21 = vmul.f32 %v2570_v26, %v2535_v52 }
 0x3c5   : > { %v2576_v23 = vmul.f32 %v2570_v26, %v2536_v60  ;;  %v2577_v27 = vmul.f32 %v2570_v26, %v2537_v8 }
 0x3c6   : > { %v2583_v29 = vadd.f32 %v2581_v54, %v2572_v61  ;;  %v2584_v33 = vadd.f32 %v2581_v54, %v2573_v62  ;;  %v2585_v3 = vadd.f32 %v2581_v54, %v2574_v19  ;;  %v2586_v39 = vadd.f32 %v2581_v54, %v2575_v21 }
 0x3c7   : > { %v2587_v35 = vadd.f32 %v2581_v54, %v2576_v23  ;;  %v2588_v42 = vadd.f32 %v2581_v54, %v2577_v27 }
 0x3c8   : > { %v2589_v43 = vmax.f32 %v2583_v29, 0.0  ;;  %v2590_v44 = vmax.f32 %v2584_v33, 0.0  ;;  %v2591_v7 = vmax.f32 %v2585_v3, 0.0  ;;  %v2592_v49 = vmax.f32 %v2586_v39, 0.0 }
 0x3c9   : > { %v2593_v11 = vmax.f32 %v2587_v35, 0.0  ;;  %v2594_v53 = vmax.f32 %v2588_v42, 0.0 }
 0x3ca   : > { %v2595_v31 = vmul.f32 %v2589_v43, %v5967_v16  ;;  %v2596_v50 = vmul.f32 %v2590_v44, %v5969_v46  ;;  %v2597_v51 = vmul.f32 %v2591_v7, %v5977_v57  ;;  %v2598_v14 = vmul.f32 %v2592_v49, %v5980_v28 }
 0x3cb   : > { %v2599_v52 = vmul.f32 %v2593_v11, %v5984_v55  ;;  %v2600_v60 = vmul.f32 %v2594_v53, %v5987_v20 }
 0x3cc   : > { %v2609_v8 = vcombine.low %v2595_v31, %v2596_v50  ;;  %v2610_v18 = vcombine.low %v2597_v51, %v2598_v14 }
 0x3cd   : > { %v2626_v2 = vcombine.low %v2599_v52, %v2600_v60 }
 0x3ce   : > { %v2617_v48 = vrot.slane %v2609_v8, %v5425_v5  ;;  %v2624_v6 = vrot.slane %v2610_v18, %v5425_v5 }
 0x3cf   : > { %5095 = vst.sshfl [vmem:[#allocation2 + $0xc] sm:$0x33 pattern:$0x76325410] %v2626_v2 }
 0x3d0   : > { %v2625_v56 = vcombine.low %v2617_v48, %v2624_v6  ;;  %v5360_v25 = vcombine.low %v2624_v6, %v2624_v6  ;;  %v5361_v1 = vcombine.low %v2617_v48, %v2617_v48 }
 0x3d2   : > { %2636 = vst [vmem:[#allocation2 + $0x4] sm:$0xff] %v2625_v56  ;;  %v3037_v47 = vrot.slane %v2625_v56, %v5425_v5  ;;  %5097 = vst.sshfl [vmem:[#allocation3 + $0x30] sm:$0x3 pattern:$0x76325410] %v2625_v56  ;;  %v6026_v30 = vrot.slane %v5360_v25, %v5425_v5  ;;  %v3107_v24 = vrot.slane %v5361_v1, %v5425_v5 }
 0x3d3   : > { %5098 = vst.sshfl [vmem:[#allocation3 + $0x40] sm:$0x3 pattern:$0x76325410] %v5360_v25 }
 0x3d4   : > { %3066 = vrot.lane.b32.xlu0 %v3037_v47, %s5376_s29  ;;  %v2935_v9 = vcombine.high %v3037_v47, %v3037_v47  ;;  %v6030_v10 = vcombine.high %v6026_v30, %v6026_v30  ;;  %v3116_v36 = vcombine.low %v3037_v47, %v3037_v47  ;;  %v2976_v63 = vcombine.high %v3107_v24, %v3107_v24 }
 0x3d5   : > { %v3115_v58 = vcombine.low %v3107_v24, %v3107_v24  ;;  %v3046_v35 = vcombine.low %v6026_v30, %v6026_v30 }
 0x3d6   : > { %2952 = vst [vmem:[#allocation3 + $0x38] sm:$0x3] %v2935_v9  ;;  %v5096_v45 = vld.sshfl [vmem:[#allocation2 + $0xc] sm:$0x33 pattern:$0x76325410] }
 0x3d7   : > { %2954 = vst [vmem:[#allocation3 + $0x48] sm:$0x3] %v6030_v10  ;;  %2955 = vst [vmem:[#allocation3 + $0x50] sm:$0x3] %v5096_v45  ;;  %v2944_v12 = vcombine.high %v5096_v45, %v5096_v45  ;;  %v2958_v29 = vld [vmem:[#allocation2 + $0xc] sm:$0x3f] }
 0x3d8   : > { %v2978_v39 = vcombine.low %v2958_v29, %v2958_v29  ;;  %v3027_v49 = vld [vmem:[#allocation2 + $0xc] sm:$0x3f] }
 0x3d9   : > { %v2707_v17 = vld [vmem:[#allocation2 + $0x2] sm:$0xff]  ;;  %2956 = vst [vmem:[#allocation3 + $0x58] sm:$0x3] %v2944_v12  ;;  %v6045_v22 = vld [vmem:[#allocation2 + $0xa] sm:$0x3f]  ;;  %v3054_v53 = vrot.slane %v3027_v49, %v5425_v5 }
 0x3da   : > { %v2725_v4 = vrot.slane %v2707_v17, %v5425_v5  ;;  %v2850_v15 = vcombine.low %v2707_v17, %v2707_v17  ;;  %v2666_v38 = vrot.slane %v6045_v22, %v5425_v5  ;;  %v2642_v32 = vcombine.high %v2707_v17, %v2707_v17  ;;  %v2708_v0 = vld [vmem:[#allocation2 + $0xa] sm:$0x3f] }
 0x3db   : > { %v2728_v26 = vcombine.low %v2708_v0, %v2708_v0  ;;  %v6068_v54 = vld [vmem:[#allocation2 + $0xa] sm:$0x3f]  ;;  %v2985_v43 = vrot.slane %v2978_v39, %v5425_v5  ;;  %v3062_v50 = vcombine.low %v3054_v53, %v3054_v53  ;;  %v2659_v14 = vcombine.high %v6045_v22, %v6045_v22 }
 0x3dc   : > { %2748 = vrot.lane.b32.xlu1 %v2725_v4, %s5372_s25  ;;  %2675 = vrot.lane.b32.xlu0 %v2725_v4, %s5374_s27  ;;  %v6039_v13 = vrot.slane %v2850_v15, %v5425_v5  ;;  %v2795_v59 = vcombine.low %v2725_v4, %v2725_v4  ;;  %v2657_v40 = vcombine.high %v2725_v4, %v2725_v4  ;;  %v2847_v27 = vld [vmem:[#allocation2 + $0xa] sm:$0x3f] }
 0x3dd   : > { %v2656_v41 = vrot.slane %v2642_v32, %v5425_v5  ;;  %v2735_v61 = vrot.slane %v2728_v26, %v5425_v5  ;;  %v2804_v62 = vrot.slane %v6068_v54, %v5425_v5  ;;  %v2674_v23 = vcombine.high %v2666_v38, %v2666_v38  ;;  %v3097_v11 = vld [vmem:[#allocation2 + $0xc] sm:$0x3f] }
 0x3de   : > { %v2726_v21 = vcombine.high %v6039_v13, %v6039_v13  ;;  %v2867_v3 = vcombine.low %v2847_v27, %v2847_v27  ;;  %v2865_v44 = vcombine.low %v6039_v13, %v6039_v13  ;;  %v2993_v7 = vcombine.high %v2985_v43, %v2985_v43  ;;  %v3167_v2 = vld [vmem:[#allocation2 + $0xc] sm:$0x3f] }
 0x3df   : > { %v2812_v19 = vcombine.low %v2804_v62, %v2804_v62  ;;  %v2796_v33 = vcombine.low %v2656_v41, %v2656_v41  ;;  %v3117_v31 = vcombine.low %v3097_v11, %v3097_v11  ;;  %v2658_v52 = vcombine.high %v2656_v41, %v2656_v41 }
 0x3e0   : > { %2816 = vrot.lane.b32.xlu1 %v2725_v4, %s5371_s24  ;;  %2890 = vrot.lane.b32.xlu0 %v2725_v4, %s5373_s26  ;;  %v2874_v42 = vrot.slane %v2867_v3, %v5425_v5  ;;  %v2743_v8 = vcombine.high %v2735_v61, %v2735_v61  ;;  %v2673_v18 = vrot.slane %v2659_v14, %v5425_v5 }
 0x3e1   : > { %v3124_v51 = vrot.slane %v3117_v31, %v5425_v5  ;;  %v2742_v48 = vrot.slane %v2708_v0, %v5425_v5  ;;  %v2881_v6 = vrot.slane %v2847_v27, %v5425_v5  ;;  %v3194_v56 = vrot.slane %v3167_v2, %v5425_v5 }
 0x3e2   : > { %v3131_v4 = vrot.slane %v3097_v11, %v5425_v5 }
 0x3e3   : > { %v3132_v60 = vcombine.low %v3124_v51, %v3124_v51  ;;  %v2883_v25 = vcombine.low %v2881_v6, %v2881_v6 }
 0x3e4   : > { %2998 = vrot.lane.b32.xlu1 %v3037_v47, %s5375_s28  ;;  %2886 = vrot.lane.b32.xlu0 %v6039_v13, %s5373_s26  ;;  %v3133_v15 = vcombine.low %v3131_v4, %v3131_v4 }
 0x3e8   : > { %3203 = vrot.lane.b32.xlu1 %v3037_v47, %s5378_s6  ;;  %3136 = vrot.lane.b32.xlu0 %v3107_v24, %s5377_s30 }
 0x3ec   : > { %2683 = vrot.lane.b32.xlu1 %v2666_v38, %s5374_s27  ;;  %2814 = vrot.lane.b32.xlu0 %v2795_v59, %s5371_s24 }
 0x3f0   : > { %2677 = vrot.lane.b32.xlu1 %v2657_v40, %s5374_s27  ;;  %2994 = vrot.lane.b32.xlu0 %v3107_v24, %s5375_s28 }
 0x3f4   : > { %2679 = vrot.lane.b32.xlu1 %v2656_v41, %s5374_s27  ;;  %3207 = vrot.lane.b32.xlu0 %v6026_v30, %s5378_s6 }
 0x3f8   : > { %2888 = vrot.lane.b32.xlu1 %v2795_v59, %s5373_s26  ;;  %2750 = vrot.lane.b32.xlu0 %v2657_v40, %s5372_s25  ;;  %v3187_v59 = vcombine.high %v3167_v2, %v3167_v2 }
 0x3fa   : > { %v3201_v32 = vrot.slane %v3187_v59, %v5425_v5 }
 0x3fc   : > { %3138 = vrot.lane.b32.xlu1 %v3116_v36, %s5377_s30  ;;  %2820 = vrot.lane.b32.xlu0 %v2656_v41, %s5371_s24 }
 0x400   : > { %2744 = vrot.lane.b32.xlu1 %v6039_v13, %s5372_s25  ;;  %2996 = vrot.lane.b32.xlu0 %v2976_v63, %s5375_s28  ;;  %v2882_v13 = vcombine.low %v2874_v42, %v2874_v42 }
 0x404   : > { %3064 = vrot.lane.b32.xlu1 %v3116_v36, %s5376_s29  ;;  %3134 = vrot.lane.b32.xlu0 %v3115_v58, %s5377_s30 }
 0x408   : > { %3205 = vrot.lane.b32.xlu1 %v2935_v9, %s5378_s6  ;;  %3000 = vrot.lane.b32.xlu0 %v2935_v9, %s5375_s28  ;;  %v2992_v9 = vrot.slane %v2958_v29, %v5425_v5 }
 0x40c   : > { %2752 = vrot.lane.b32.xlu1 %v2735_v61, %s5372_s25  ;;  %3070 = vrot.lane.b32.xlu0 %v6026_v30, %s5376_s29  ;;  %v3202_v30 = vcombine.high %v3194_v56, %v3194_v56 }
 0x410   : > { %2822 = vrot.lane.b32.xlu1 %v2812_v19, %s5371_s24  ;;  %3140 = vrot.lane.b32.xlu0 %v3037_v47, %s5377_s30  ;;  %v3047_v47 = vcombine.high %v3027_v49, %v3027_v49 }
 0x412   : > { %v3061_v45 = vrot.slane %v3047_v47, %v5425_v5 }
 0x414   : > { %2746 = vrot.lane.b32.xlu1 %v2726_v21, %s5372_s25  ;;  %2685 = vrot.lane.b32.xlu0 %v2674_v23, %s5374_s27  ;;  %v3063_v17 = vcombine.low %v3061_v45, %v3061_v45 }
 0x418   : > { %2818 = vrot.lane.b32.xlu1 %v2796_v33, %s5371_s24  ;;  %2824 = vrot.lane.b32.xlu0 %v2804_v62, %s5371_s24 }
 0x41c   : > { %3068 = vrot.lane.b32.xlu1 %v3046_v35, %s5376_s29  ;;  %2894 = vrot.lane.b32.xlu0 %v2874_v42, %s5373_s26 }
 0x420   : > { %2884 = vrot.lane.b32.xlu1 %v2865_v44, %s5373_s26  ;;  %3004 = vrot.lane.b32.xlu0 %v2993_v7, %s5375_s28 }
 0x424   : > { %3002 = vrot.lane.b32.xlu1 %v2985_v43, %s5375_s28  ;;  %3074 = vrot.lane.b32.xlu0 %v3054_v53, %s5376_s29 }
 0x428   : > { %3072 = vrot.lane.b32.xlu1 %v3062_v50, %s5376_s29  ;;  %3144 = vrot.lane.b32.xlu0 %v3124_v51, %s5377_s30 }
 0x42c   : > { %3142 = vrot.lane.b32.xlu1 %v3132_v60, %s5377_s30  ;;  %2681 = vrot.lane.b32.xlu0 %v2658_v52, %s5374_s27 }
 0x430   : > { %2687 = vrot.lane.b32.xlu1 %v2673_v18, %s5374_s27  ;;  %2754 = vrot.lane.b32.xlu0 %v2743_v8, %s5372_s25 }
 0x434   : > { %2756 = vrot.lane.b32.xlu1 %v2742_v48, %s5372_s25  ;;  %3209 = vrot.lane.b32.xlu0 %v6030_v10, %s5378_s6  ;;  %v2797_v10 = vcombine.high %v6068_v54, %v6068_v54  ;;  %s278_s25 = scalar_lea.vmem %s6564_s5, %s5311_s22 }
 0x436   : > { %v2811_v1 = vrot.slane %v2797_v10, %v5425_v5 }
 0x438   : > { %2896 = vrot.lane.b32.xlu1 %v2883_v25, %s5373_s26  ;;  %3213 = vrot.lane.b32.xlu0 %v3202_v30, %s5378_s6  ;;  %v2813_v12 = vcombine.low %v2811_v1, %v2811_v1 }
 0x43c   : > { %3006 = vrot.lane.b32.xlu1 %v2992_v9, %s5375_s28 }
 0x440   : > { %3076 = vrot.lane.b32.xlu1 %v3063_v17, %s5376_s29 }
 0x444   : > { %3146 = vrot.lane.b32.xlu1 %v3133_v15, %s5377_s30 }
 0x446   : > { %v6127_v24 = vpop.permute.xlu0 %3066 }
 0x448   : > { %2892 = vrot.lane.b32.xlu1 %v2882_v13, %s5373_s26 }
 0x44c   : > { %2826 = vrot.lane.b32.xlu1 %v2813_v12, %s5371_s24 }
 0x44e   : > { %v6130_v22 = vpop.permute.xlu1 %2748  ;;  %v2676_v38 = vpop.permute.xlu0 %2675 }
 0x450   : > { %3211 = vrot.lane.b32.xlu1 %v3194_v56, %s5378_s6 }
 0x452   : > { %v6133_v40 = vpop.permute.xlu1 %2816  ;;  %v6136_v41 = vpop.permute.xlu0 %2890 }
 0x454   : > { %3215 = vrot.lane.b32.xlu1 %v3201_v32, %s5378_s6 }
 0x456   : > { %v2999_v36 = vpop.permute.xlu1 %2998  ;;  %v6139_v63 = vpop.permute.xlu0 %2886 }
 0x45a   : > { %v3204_v58 = vpop.permute.xlu1 %3203  ;;  %v3137_v0 = vpop.permute.xlu0 %3136 }
 0x45e   : > { %v6141_v26 = vpop.permute.xlu1 %2683  ;;  %v2815_v54 = vpop.permute.xlu0 %2814 }
 0x45f   : > { %v2828_v61 = vsel %vm472_vm3, %v2815_v54, %v6133_v40  ;;  %v6201_v54 = vand.u32 4294901760, %v5517_v37 }
 0x460   : > { %2840 = vst [vmem:[#allocation3] sm:$0x30] %v2828_v61 }
 0x462   : > { %v2678_v62 = vpop.permute.xlu1 %2677  ;;  %v2995_v19 = vpop.permute.xlu0 %2994 }
 0x463   : > { %v2689_v21 = vsel %vm331_vm2, %v2676_v38, %v2678_v62 }
 0x464   : > { %2701 = vst [vmem:[#allocation3] sm:$0x3] %v2689_v21 }
 0x466   : > { %v6146_v23 = vpop.permute.xlu1 %2679  ;;  %v6148_v27 = vpop.permute.xlu0 %3207 }
 0x467   : > { %v2690_v29 = vsel %vm331_vm2, %v2678_v62, %v6146_v23 }
 0x468   : > { %2702 = vst [vmem:[#allocation3 + $0x8] sm:$0x3] %v2690_v29 }
 0x46a   : > { %v2889_v33 = vpop.permute.xlu1 %2888  ;;  %v2751_v3 = vpop.permute.xlu0 %2750 }
 0x46b   : > { %v2899_v39 = vsel %vm543_vm4, %v6139_v63, %v2889_v33  ;;  %v2900_v35 = vsel %vm543_vm4, %v2889_v33, %v6136_v41  ;;  %v2760_v42 = vsel %vm401_vm1, %v6130_v22, %v2751_v3 }
 0x46c   : > { %2911 = vst [vmem:[#allocation3 + $0x8] sm:$0xc0] %v2899_v39  ;;  %2912 = vst [vmem:[#allocation3 + $0x10] sm:$0xc0] %v2900_v35  ;;  %v6210_v35 = vsub.f32 %v5517_v37, %v6201_v54 }
 0x46d   : > { %2772 = vst [vmem:[#allocation3 + $0x10] sm:$0xc] %v2760_v42 }
 0x46e   : > { %v3139_v43 = vpop.permute.xlu1 %3138  ;;  %v2821_v44 = vpop.permute.xlu0 %2820 }
 0x46f   : > { %v3149_v7 = vsel %vm796_vm7, %v3137_v0, %v3139_v43 }
 0x470   : > { %3161 = vst [vmem:[#allocation3 + $0x38] sm:$0xc0] %v3149_v7 }
 0x472   : > { %v2745_v49 = vpop.permute.xlu1 %2744  ;;  %v2997_v11 = vpop.permute.xlu0 %2996 }
 0x473   : > { %v3008_v53 = vsel %vm654_vm5, %v2995_v19, %v2997_v11  ;;  %v3009_v31 = vsel %vm654_vm5, %v2997_v11, %v2999_v36 }
 0x474   : > { %3020 = vst [vmem:[#allocation3 + $0x30] sm:$0xc] %v3008_v53  ;;  %3021 = vst [vmem:[#allocation3 + $0x38] sm:$0xc] %v3009_v31 }
 0x476   : > { %v3065_v50 = vpop.permute.xlu1 %3064  ;;  %v3135_v51 = vpop.permute.xlu0 %3134 }
 0x477   : > { %v3078_v14 = vsel %vm725_vm6, %v3065_v50, %v6127_v24  ;;  %v3148_v52 = vsel %vm796_vm7, %v3135_v51, %v3137_v0 }
 0x478   : > { %3090 = vst [vmem:[#allocation3 + $0x30] sm:$0x30] %v3078_v14  ;;  %3160 = vst [vmem:[#allocation3 + $0x30] sm:$0xc0] %v3148_v52  ;;  %v6228_v14 = vand.u32 4294901760, %v6210_v35 }
 0x47a   : > { %v3206_v60 = vpop.permute.xlu1 %3205  ;;  %v3001_v8 = vpop.permute.xlu0 %3000 }
 0x47b   : > { %v3217_v18 = vsel %vm866_vm8, %v3204_v58, %v3206_v60  ;;  %v3218_v2 = vsel %vm866_vm8, %v3206_v60, %v6148_v27  ;;  %v3010_v48 = vsel %vm654_vm5, %v2999_v36, %v3001_v8 }
 0x47c   : > { %3229 = vst [vmem:[#allocation3 + $0x60] sm:$0x3] %v3217_v18  ;;  %3230 = vst [vmem:[#allocation3 + $0x68] sm:$0x3] %v3218_v2 }
 0x47d   : > { %3022 = vst [vmem:[#allocation3 + $0x40] sm:$0xc] %v3010_v48 }
 0x47e   : > { %v6168_v6 = vpop.permute.xlu1 %2752  ;;  %v6170_v56 = vpop.permute.xlu0 %3070 }
 0x47f   : > { %v2761_v47 = vsel %vm401_vm1, %v2751_v3, %v6168_v6  ;;  %v3242_v61 = vld [vmem:[#allocation3 + $0x30] sm:$0xff] }
 0x480   : > { %2773 = vst [vmem:[#allocation3 + $0x18] sm:$0xc] %v2761_v47  ;;  %v3281_v39 = vand.u32 4294901760, %v3242_v61 }
 0x482   : > { %v2823_v25 = vpop.permute.xlu1 %2822  ;;  %v6174_v30 = vpop.permute.xlu0 %3140  ;;  %v6222_v37 = vsub.f32 %v3242_v61, %v3281_v39 }
 0x483   : > { %v2831_v9 = vsel %vm472_vm3, %v2821_v44, %v2823_v25  ;;  %v3150_v45 = vsel %vm796_vm7, %v3139_v43, %v6174_v30 }
 0x484   : > { %2843 = vst [vmem:[#allocation3 + $0x18] sm:$0x30] %v2831_v9  ;;  %3162 = vst [vmem:[#allocation3 + $0x40] sm:$0xc0] %v3150_v45 }
 0x486   : > { %v2747_v17 = vpop.permute.xlu1 %2746  ;;  %v6179_v4 = vpop.permute.xlu0 %2685 }
 0x487   : > { %v2758_v10 = vsel %vm401_vm1, %v2745_v49, %v2747_v17  ;;  %v2759_v15 = vsel %vm401_vm1, %v2747_v17, %v6130_v22  ;;  %v2693_v13 = vsel %vm331_vm2, %v6141_v26, %v6179_v4 }
 0x488   : > { %2770 = vst [vmem:[#allocation3] sm:$0xc] %v2758_v10  ;;  %2771 = vst [vmem:[#allocation3 + $0x8] sm:$0xc] %v2759_v15  ;;  %v3377_v10 = vand.u32 4294901760, %v6222_v37 }
 0x489   : > { %2705 = vst [vmem:[#allocation3 + $0x20] sm:$0x3] %v2693_v13 }
 0x48a   : > { %v2819_v1 = vpop.permute.xlu1 %2818  ;;  %v6187_v12 = vpop.permute.xlu0 %2824 }
 0x48b   : > { %v2829_v38 = vsel %vm472_vm3, %v6133_v40, %v2819_v1  ;;  %v2830_v59 = vsel %vm472_vm3, %v2819_v1, %v2821_v44  ;;  %v2832_v32 = vsel %vm472_vm3, %v2823_v25, %v6187_v12  ;;  %v3249_v40 = vld [vmem:[#allocation3 + $0x68] sm:$0x3] }
 0x48c   : > { %2841 = vst [vmem:[#allocation3 + $0x8] sm:$0x30] %v2829_v38  ;;  %2842 = vst [vmem:[#allocation3 + $0x10] sm:$0x30] %v2830_v59  ;;  %v3261_v33 = vsel %vm908_vm9, %v3249_v40, 0 }
 0x48d   : > { %2844 = vst [vmem:[#allocation3 + $0x20] sm:$0x30] %v2832_v32  ;;  %v6216_v7 = vand.u32 4294901760, %v3261_v33 }
 0x48e   : > { %v3069_v22 = vpop.permute.xlu1 %3068  ;;  %v6194_v36 = vpop.permute.xlu0 %2894 }
 0x48f   : > { %v3079_v58 = vsel %vm725_vm6, %v6127_v24, %v3069_v22  ;;  %v3080_v0 = vsel %vm725_vm6, %v3069_v22, %v6170_v56  ;;  %v3248_v24 = vld [vmem:[#allocation3 + $0x60] sm:$0x3]  ;;  %v6237_v2 = vsub.f32 %v3261_v33, %v6216_v7 }
 0x490   : > { %3091 = vst [vmem:[#allocation3 + $0x38] sm:$0x30] %v3079_v58  ;;  %3092 = vst [vmem:[#allocation3 + $0x40] sm:$0x30] %v3080_v0 }
 0x491   : > { %v3383_v22 = vand.u32 4294901760, %v6237_v2 }
 0x492   : > { %v2885_v62 = vpop.permute.xlu1 %2884  ;;  %v6203_v19 = vpop.permute.xlu0 %3004 }
 0x493   : > { %v2898_v21 = vsel %vm543_vm4, %v2885_v62, %v6139_v63  ;;  %v3237_v29 = vld [vmem:[#allocation3 + $0x8] sm:$0xff]  ;;  %v3258_v63 = vsel %vm908_vm9, %v3248_v24, 0 }
 0x494   : > { %2910 = vst [vmem:[#allocation3] sm:$0xc0] %v2898_v21  ;;  %v3275_v3 = vand.u32 4294901760, %v3237_v29  ;;  %v6225_v51 = vand.u32 4294901760, %v3258_v63 }
 0x496   : > { %v3003_v42 = vpop.permute.xlu1 %3002  ;;  %v6212_v43 = vpop.permute.xlu0 %3074  ;;  %v6214_v44 = vsub.f32 %v3237_v29, %v3275_v3  ;;  %v6250_v15 = vsub.f32 %v3258_v63, %v6225_v51 }
 0x497   : > { %v3011_v49 = vsel %vm654_vm5, %v3001_v8, %v3003_v42  ;;  %v3012_v11 = vsel %vm654_vm5, %v3003_v42, %v6203_v19  ;;  %v3243_v53 = vld [vmem:[#allocation3 + $0x38] sm:$0xff] }
 0x498   : > { %3023 = vst [vmem:[#allocation3 + $0x48] sm:$0xc] %v3011_v49  ;;  %3024 = vst [vmem:[#allocation3 + $0x50] sm:$0xc] %v3012_v11  ;;  %v3279_v31 = vand.u32 4294901760, %v3243_v53  ;;  %v3359_v50 = vand.u32 4294901760, %v6214_v44  ;;  %v3384_v49 = vsub.f32 %v6237_v2, %v3383_v22 }
 0x49a   : > { %v3073_v52 = vpop.permute.xlu1 %3072  ;;  %v6230_v60 = vpack.c.bf16 %v3279_v31, %v3275_v3  ;;  %v6232_v8 = vsub.f32 %v3243_v53, %v3279_v31  ;;  %v6234_v18 = vpop.permute.xlu0 %3144  ;;  %v3360_v45 = vsub.f32 %v6214_v44, %v3359_v50 }
 0x49b   : > { %v3081_v48 = vsel %vm725_vm6, %v6170_v56, %v3073_v52  ;;  %v3082_v47 = vsel %vm725_vm6, %v3073_v52, %v6212_v43  ;;  %v3236_v25 = vld [vmem:[#allocation3] sm:$0xff]  ;;  %v3349_v56 = vsub.f32 %v6210_v35, %v6228_v14 }
 0x49c   : > { %3093 = vst [vmem:[#allocation3 + $0x48] sm:$0x30] %v3081_v48  ;;  %3094 = vst [vmem:[#allocation3 + $0x50] sm:$0x30] %v3082_v47  ;;  %5179 = vmatprep.subr.bf16.mxu1 %v6230_v60  ;;  %v3277_v9 = vand.u32 4294901760, %v3236_v25  ;;  %v3371_v17 = vand.u32 4294901760, %v6232_v8 }
 0x49d   : > { %v3361_v62 = vand.u32 4294901760, %v3360_v45  ;;  %v3385_v47 = vand.u32 4294901760, %v3384_v49 }
 0x49e   : > { %v3143_v13 = vpop.permute.xlu1 %3142  ;;  %v6254_v1 = vpack.c.bf16 %v3281_v39, %v3277_v9  ;;  %v6256_v38 = vsub.f32 %v3236_v25, %v3277_v9  ;;  %v2682_v59 = vpop.permute.xlu0 %2681  ;;  %v3372_v32 = vsub.f32 %v6232_v8, %v3371_v17  ;;  %v3389_v39 = vand.u32 4294901760, %v6250_v15 }
 0x49f   : > { %v3151_v58 = vsel %vm796_vm7, %v6174_v30, %v3143_v13  ;;  %v3152_v0 = vsel %vm796_vm7, %v3143_v13, %v6234_v18  ;;  %v2691_v40 = vsel %vm331_vm2, %v6146_v23, %v2682_v59  ;;  %v2692_v61 = vsel %vm331_vm2, %v2682_v59, %v6141_v26 }
 0x4a0   : > { %3163 = vst [vmem:[#allocation3 + $0x48] sm:$0xc0] %v3151_v58  ;;  %3164 = vst [vmem:[#allocation3 + $0x50] sm:$0xc0] %v3152_v0  ;;  %5181 = vmatpush1.bf16.msra.mxu1 %v6254_v1  ;;  %v3373_v21 = vand.u32 4294901760, %v3372_v32  ;;  %v3365_v29 = vand.u32 4294901760, %v6256_v38  ;;  %v3378_v30 = vsub.f32 %v6222_v37, %v3377_v10  ;;  %v5186_v13 = vpack.c.bf16 %v6232_v8, %v6214_v44 }
 0x4a1   : > { %2703 = vst [vmem:[#allocation3 + $0x10] sm:$0x3] %v2691_v40  ;;  %2704 = vst [vmem:[#allocation3 + $0x18] sm:$0x3] %v2692_v61  ;;  %3284 = vmatprep.subr.mxu1 %v6216_v7  ;;  %v6276_v23 = vand.u32 4294901760, %v3349_v56  ;;  %v5188_v59 = vpack.c.bf16 %v6222_v37, %v6256_v38 }
 0x4a2   : > { %v2688_v33 = vpop.permute.xlu1 %2687  ;;  %v5182_v26 = vpack.c.bf16 %v3373_v21, %v3361_v62  ;;  %v2755_v24 = vpop.permute.xlu0 %2754  ;;  %v3366_v3 = vsub.f32 %v6256_v38, %v3365_v29  ;;  %v3379_v53 = vand.u32 4294901760, %v3378_v30  ;;  %v5196_v44 = vpack.c.bf16 %v3377_v10, %v3365_v29 }
 0x4a3   : > { %v2694_v42 = vsel %vm331_vm2, %v6179_v4, %v2688_v33  ;;  %v2762_v63 = vsel %vm401_vm1, %v6168_v6, %v2755_v24  ;;  %v3390_v6 = vsub.f32 %v6250_v15, %v3389_v39  ;;  %v3244_v33 = vld [vmem:[#allocation3 + $0x40] sm:$0xff] }
 0x4a4   : > { %2706 = vst [vmem:[#allocation3 + $0x28] sm:$0x3] %v2694_v42  ;;  %3286 = vmatpush1.msra.mxu1 %v6225_v51  ;;  %2774 = vst [vmem:[#allocation3 + $0x20] sm:$0xc] %v2762_v63  ;;  %v3367_v11 = vand.u32 4294901760, %v3366_v3  ;;  %v3798_v8 = vand.u32 4294901760, %v3244_v33 }
 0x4a5   : > { %3351 = vmatmul.mubr.f32.vlgmr.msra.gmra.mrb[2].mxu1 %v6276_v23  ;;  %5183 = vmatprep.subr.bf16.mxu1 %v5182_v26  ;;  %v3391_v45 = vand.u32 4294901760, %v3390_v6 }
 0x4a6   : > { %v2757_v31 = vpop.permute.xlu1 %2756  ;;  %v5184_v52 = vpack.c.bf16 %v3379_v53, %v3367_v11  ;;  %v6291_v48 = vpop.permute.xlu0 %3209  ;;  %3451 = vmatprep.mubr.f32.mxu1 %v5379_v34  ;;  %v6345_v29 = vsub.f32 %v3244_v33, %v3798_v8 }
 0x4a7   : > { %v2763_v4 = vsel %vm401_vm1, %v2755_v24, %v2757_v31  ;;  %v3219_v25 = vsel %vm866_vm8, %v6148_v27, %v6291_v48  ;;  %v3246_v3 = vld [vmem:[#allocation3 + $0x50] sm:$0xff] }
 0x4a8   : > { %2775 = vst [vmem:[#allocation3 + $0x28] sm:$0xc] %v2763_v4  ;;  %5185 = vmatpush1.bf16.msra.mxu1 %v5184_v52  ;;  %3231 = vst [vmem:[#allocation3 + $0x70] sm:$0x3] %v3219_v25  ;;  %v3238_v62 = vld [vmem:[#allocation3 + $0x10] sm:$0xff]  ;;  %v4315_v42 = vand.u32 4294901760, %v3246_v3 }
 0x4a9   : > { %3386 = vmatprep.subr.mxu1 %v3385_v47  ;;  %v3794_v26 = vand.u32 4294901760, %v3238_v62 }
 0x4aa   : > { %v2897_v9 = vpop.permute.xlu1 %2896  ;;  %v3214_v49 = vpop.permute.xlu0 %3213  ;;  %v6359_v4 = vsub.f32 %v3246_v3, %v4315_v42 }
 0x4ab   : > { %v2903_v56 = vsel %vm543_vm4, %v6194_v36, %v2897_v9 }
 0x4ac   : > { %2915 = vst [vmem:[#allocation3 + $0x28] sm:$0xc0] %v2903_v56  ;;  %3392 = vmatpush1.msra.mxu1 %v3391_v45  ;;  %v6370_v45 = vpack.c.bf16 %v3798_v8, %v3794_v26 }
 0x4ad   : > { %3453 = vmatmul.mubr.f32.vlgmr.msra.gmra.mrb[2].mxu1 %v6201_v54  ;;  %5187 = vmatprep.subr.bf16.mxu1 %v5186_v13 }
 0x4ae   : > { %5189 = vmatpush1.bf16.msra.mxu1 %v5188_v59  ;;  %v3007_v27 = vpop.permute.xlu1 %3006  ;;  %3535 = vmatprep.mubr.f32.mxu1 %v5379_v34 }
 0x4af   : > { %v3013_v32 = vsel %vm654_vm5, %v6203_v19, %v3007_v27  ;;  %3473 = vmatprep.subr.mxu1 %v6237_v2  ;;  %v3245_v19 = vld [vmem:[#allocation3 + $0x48] sm:$0xff]  ;;  %v3250_v38 = vld [vmem:[#allocation3 + $0x70] sm:$0x3] }
 0x4b0   : > { %3025 = vst [vmem:[#allocation3 + $0x58] sm:$0xc] %v3013_v32  ;;  %v3796_v21 = vand.u32 4294901760, %v3245_v19  ;;  %v3264_v6 = vsel %vm908_vm9, %v3250_v38, 0 }
 0x4b1   : > { %v6373_v56 = vand.u32 4294901760, %v3264_v6 }
 0x4b2   : > { %3476 = vmatpush1.msra.mxu1 %v6250_v15  ;;  %v3077_v58 = vpop.permute.xlu1 %3076 }
 0x4b3   : > { %v3083_v0 = vsel %vm725_vm6, %v6212_v43, %v3077_v58  ;;  %5191 = vmatprep.subr.bf16.mxu1 %v6230_v60  ;;  %v5194_v43 = vpack.c.bf16 %v3371_v17, %v3359_v50  ;;  %v6336_v50 = vsub.f32 %v3245_v19, %v3796_v21 }
 0x4b4   : > { %3095 = vst [vmem:[#allocation3 + $0x58] sm:$0x30] %v3083_v0 }
 0x4b5   : > { %3538 = vmatmul.mubr.f32.vlgmr.msra.gmra.mrb[2].mxu1 %v6210_v35  ;;  %v3888_v63 = vand.u32 4294901760, %v6336_v50 }
 0x4b6   : > { %5193 = vmatpush1.bf16.msra.mxu1 %v6254_v1  ;;  %v3147_v40 = vpop.permute.xlu1 %3146  ;;  %3614 = vmatprep.mubr.f32.mxu1 %v5379_v34 }
 0x4b7   : > { %3553 = vmatprep.subr.mxu1 %v6216_v7  ;;  %v3153_v61 = vsel %vm796_vm7, %v6234_v18, %v3147_v40 }
 0x4b8   : > { %3165 = vst [vmem:[#allocation3 + $0x58] sm:$0xc0] %v3153_v61  ;;  %v4411_v61 = vand.u32 4294901760, %v6359_v4 }
 0x4ba   : > { %3555 = vmatpush1.msra.mxu1 %v6225_v51  ;;  %v2893_v30 = vpop.permute.xlu1 %2892 }
 0x4bb   : > { %5195 = vmatprep.subr.bf16.mxu1 %v5194_v43  ;;  %v2901_v24 = vsel %vm543_vm4, %v6136_v41, %v2893_v30  ;;  %v2902_v18 = vsel %vm543_vm4, %v2893_v30, %v6194_v36  ;;  %v6339_v41 = vsub.f32 %v3238_v62, %v3794_v26 }
 0x4bc   : > { %2913 = vst [vmem:[#allocation3 + $0x18] sm:$0xc0] %v2901_v24  ;;  %2914 = vst [vmem:[#allocation3 + $0x20] sm:$0xc0] %v2902_v18 }
 0x4bd   : > { %3618 = vmatmul.mubr.f32.vlgmr.msra.gmra.mrb[2].mxu1 %v6228_v14  ;;  %v3882_v2 = vand.u32 4294901760, %v6339_v41 }
 0x4be   : > { %5197 = vmatpush1.bf16.msra.mxu1 %v5196_v44  ;;  %v2827_v17 = vpop.permute.xlu1 %2826  ;;  %3706 = vmatprep.mubr.f32.mxu1 %v5379_v34 }
 0x4bf   : > { %3643 = vmatprep.subr.mxu1 %v3383_v22  ;;  %v2833_v36 = vsel %vm472_vm3, %v6187_v12, %v2827_v17  ;;  %v3247_v37 = vld [vmem:[#allocation3 + $0x58] sm:$0xff] }
 0x4c0   : > { %2845 = vst [vmem:[#allocation3 + $0x28] sm:$0x30] %v2833_v36  ;;  %v4313_v10 = vand.u32 4294901760, %v3247_v37 }
 0x4c2   : > { %3647 = vmatpush1.msra.mxu1 %v3389_v39  ;;  %v3212_v11 = vpop.permute.xlu1 %3211  ;;  %v6355_v31 = vsub.f32 %v3247_v37, %v4313_v10 }
 0x4c3   : > { %5199 = vmatprep.subr.bf16.mxu1 %v6230_v60  ;;  %v3220_v12 = vsel %vm866_vm8, %v6291_v48, %v3212_v11  ;;  %v3221_v22 = vsel %vm866_vm8, %v3212_v11, %v3214_v49  ;;  %v3239_v53 = vld [vmem:[#allocation3 + $0x18] sm:$0xff]  ;;  %v3240_v52 = vld [vmem:[#allocation3 + $0x20] sm:$0xff]  ;;  %v3889_v60 = vsub.f32 %v6336_v50, %v3888_v63  ;;  %v3894_v48 = vand.u32 4294901760, %v6345_v29 }
 0x4c4   : > { %3232 = vst [vmem:[#allocation3 + $0x78] sm:$0x3] %v3220_v12  ;;  %3233 = vst [vmem:[#allocation3 + $0x80] sm:$0x3] %v3221_v22  ;;  %v3792_v15 = vand.u32 4294901760, %v3239_v53  ;;  %v4311_v39 = vand.u32 4294901760, %v3240_v52  ;;  %v4412_v11 = vsub.f32 %v6359_v4, %v4411_v61 }
 0x4c5   : > { %3708 = vmatmul.mubr.f32.vlgmr.msra.gmra.mrb[2].mxu1 %v6201_v54  ;;  %v4405_v32 = vand.u32 4294901760, %v6355_v31  ;;  %v3895_v40 = vsub.f32 %v6345_v29, %v3894_v48 }
 0x4c6   : > { %5201 = vmatpush1.bf16.msra.mxu1 %v6254_v1  ;;  %v3216_v47 = vpop.permute.xlu1 %3215  ;;  %v6366_v25 = vpack.c.bf16 %v3796_v21, %v3792_v15  ;;  %v6368_v9 = vsub.f32 %v3239_v53, %v3792_v15  ;;  %3784 = vmatprep.mubr.f32.mxu1 %v5379_v34  ;;  %v6377_v27 = vsub.f32 %v3240_v52, %v4311_v39 }
 0x4c7   : > { %3723 = vmatprep.subr.mxu1 %v6216_v7  ;;  %v3222_v13 = vsel %vm866_vm8, %v3214_v49, %v3216_v47  ;;  %v3241_v59 = vld [vmem:[#allocation3 + $0x28] sm:$0xff]  ;;  %v3883_v1 = vsub.f32 %v6339_v41, %v3882_v2  ;;  %v3890_v7 = vand.u32 4294901760, %v3889_v60  ;;  %v6397_v21 = vsub.f32 %v3264_v6, %v6373_v56 }
 0x4c8   : > { %3234 = vst [vmem:[#allocation3 + $0x88] sm:$0x3] %v3222_v13  ;;  %5203 = vmatprep.subr.bf16.mxu0 %v6366_v25  ;;  %v4309_v58 = vand.u32 4294901760, %v3241_v59  ;;  %v3876_v0 = vand.u32 4294901760, %v6368_v9  ;;  %v4399_v19 = vand.u32 4294901760, %v6377_v27  ;;  %v6402_v33 = vpack.c.bf16 %v4315_v42, %v4311_v39 }
 0x4c9   : > { %5205 = vmatpush1.bf16.msra.mxu0 %v6370_v45  ;;  %v3884_v24 = vand.u32 4294901760, %v3883_v1  ;;  %v3906_v12 = vand.u32 4294901760, %v6397_v21 }
 0x4ca   : > { %3725 = vmatpush1.msra.mxu1 %v6225_v51  ;;  %v6392_v62 = vpack.c.bf16 %v4313_v10, %v4309_v58  ;;  %v6394_v43 = vsub.f32 %v3241_v59, %v4309_v58  ;;  %v3877_v30 = vsub.f32 %v6368_v9, %v3876_v0  ;;  %v4406_v51 = vsub.f32 %v6355_v31, %v4405_v32 }
 0x4cb   : > { %v3251_v26 = vld [vmem:[#allocation3 + $0x78] sm:$0x3]  ;;  %v3252_v18 = vld [vmem:[#allocation3 + $0x80] sm:$0x3]  ;;  %v4400_v44 = vsub.f32 %v6377_v27, %v4399_v19  ;;  %v3896_v10 = vand.u32 4294901760, %v3895_v40  ;;  %v4413_v58 = vand.u32 4294901760, %v4412_v11  ;;  %v5236_v11 = vpack.c.bf16 %v6359_v4, %v6377_v27 }
 0x4cc   : > { %5227 = vmatprep.subr.bf16.mxu1 %v6392_v62  ;;  %v3267_v8 = vsel %vm908_vm9, %v3251_v26, 0  ;;  %v3878_v17 = vand.u32 4294901760, %v3877_v30  ;;  %v3270_v3 = vsel %vm908_vm9, %v3252_v18, 0  ;;  %v4393_v36 = vand.u32 4294901760, %v6394_v43 }
 0x4cd   : > { %3786 = vmatmul.mubr.f32.vlgmr.msra.gmra.mrb[2].mxu1 %v6201_v54  ;;  %v6415_v37 = vand.u32 4294901760, %v3267_v8  ;;  %v6417_v38 = vand.u32 4294901760, %v3270_v3  ;;  %v5208_v22 = vpack.c.bf16 %v3896_v10, %v3884_v24  ;;  %v4407_v60 = vand.u32 4294901760, %v4406_v51 }
 0x4ce   : > { %5229 = vmatpush1.bf16.msra.mxu1 %v6402_v33  ;;  %v5206_v42 = vpack.c.bf16 %v3890_v7, %v3878_v17  ;;  %4379 = vmatprep.mubr.f32.mxu1 %v5379_v34  ;;  %v4394_v49 = vsub.f32 %v6394_v43, %v4393_v36  ;;  %v4401_v47 = vand.u32 4294901760, %v4400_v44  ;;  %v3907_v7 = vsub.f32 %v6397_v21, %v3906_v12 }
 0x4cf   : > { %3801 = vmatprep.subr.mxu0 %v6415_v37  ;;  %v3253_v53 = vld [vmem:[#allocation3 + $0x88] sm:$0x3]  ;;  %v6430_v52 = vsub.f32 %v3270_v3, %v6417_v38  ;;  %v6433_v6 = vsub.f32 %v3267_v8, %v6415_v37  ;;  %v5210_v17 = vpack.c.bf16 %v6336_v50, %v6368_v9  ;;  %v5244_v50 = vpack.c.bf16 %v4411_v61, %v4399_v19 }
 0x4d0   : > { %3803 = vmatpush1.msra.mxu0 %v6373_v56  ;;  %v3273_v15 = vsel %vm908_vm9, %v3253_v53, 0  ;;  %v4395_v39 = vand.u32 4294901760, %v4394_v49  ;;  %v5232_v24 = vpack.c.bf16 %v4413_v58, %v4401_v47  ;;  %v3908_v44 = vand.u32 4294901760, %v3907_v7 }
 0x4d1   : > { %3868 = vmatmul.mubr.f32.vlgmr.msra.gmra.mrb[4].mxu0 %v6276_v23  ;;  %5207 = vmatprep.subr.bf16.mxu0 %v5206_v42  ;;  %v6438_v13 = vand.u32 4294901760, %v3273_v15  ;;  %v3900_v59 = vand.u32 4294901760, %v6433_v6  ;;  %v4423_v40 = vand.u32 4294901760, %v6430_v52  ;;  %v5234_v49 = vpack.c.bf16 %v6355_v31, %v6394_v43 }
 0x4d2   : > { %5209 = vmatpush1.bf16.msra.mxu0 %v5208_v22  ;;  %v5230_v1 = vpack.c.bf16 %v4407_v60, %v4395_v39  ;;  %3968 = vmatprep.mubr.f32.mxu0 %v5379_v34  ;;  %v5218_v22 = vpack.c.bf16 %v3888_v63, %v3876_v0  ;;  %v5220_v53 = vpack.c.bf16 %v3894_v48, %v3882_v2 }
 0x4d3   : > { %4318 = vmatprep.subr.mxu1 %v6438_v13  ;;  %v3901_v30 = vsub.f32 %v6433_v6, %v3900_v59  ;;  %v4416_v26 = vsub.f32 %v3273_v15, %v6438_v13  ;;  %v4424_v8 = vsub.f32 %v6430_v52, %v4423_v40 }
 0x4d4   : > { %4320 = vmatpush1.msra.mxu1 %v6417_v38 }
 0x4d5   : > { %4385 = vmatmul.mubr.f32.vlgmr.msra.gmra.mrb[4].mxu1 %v6276_v23  ;;  %5231 = vmatprep.subr.bf16.mxu1 %v5230_v1  ;;  %v3902_v18 = vand.u32 4294901760, %v3901_v30  ;;  %v4417_v51 = vand.u32 4294901760, %v4416_v26  ;;  %v5212_v23 = vpack.c.bf16 %v6345_v29, %v6339_v41  ;;  %v4425_v42 = vand.u32 4294901760, %v4424_v8 }
 0x4d6   : > { %5233 = vmatpush1.bf16.msra.mxu1 %v5232_v24  ;;  %4485 = vmatprep.mubr.f32.mxu1 %v5379_v34 }
 0x4d7   : > { %3903 = vmatprep.subr.mxu0 %v3902_v18  ;;  %v4418_v3 = vsub.f32 %v4416_v26, %v4417_v51 }
 0x4d8   : > { %3909 = vmatpush1.msra.mxu0 %v3908_v44 }
 0x4d9   : > { %3970 = vmatmul.mubr.f32.vlgmr.msra.gmra.mrb[4].mxu0 %v6201_v54  ;;  %5211 = vmatprep.subr.bf16.mxu0 %v5210_v17  ;;  %v4419_v10 = vand.u32 4294901760, %v4418_v3 }
 0x4da   : > { %5213 = vmatpush1.bf16.msra.mxu0 %v5212_v23  ;;  %4052 = vmatprep.mubr.f32.mxu0 %v5379_v34  ;;  %v5100_v23 = vld [vmem:[%s6011_s21 + $0x6] sm:$0x3] }
 0x4db   : > { %3990 = vmatprep.subr.mxu0 %v6433_v6  ;;  %4420 = vmatprep.subr.mxu1 %v4419_v10 }
 0x4dc   : > { %4426 = vmatpush1.msra.mxu1 %v4425_v42 }
 0x4dd   : > { %4487 = vmatmul.mubr.f32.vlgmr.msra.gmra.mrb[4].mxu1 %v6201_v54  ;;  %5235 = vmatprep.subr.bf16.mxu1 %v5234_v49 }
 0x4de   : > { %3993 = vmatpush1.msra.mxu0 %v6397_v21  ;;  %5237 = vmatpush1.bf16.msra.mxu1 %v5236_v11  ;;  %v5099_v11 = vld [vmem:[%s6011_s21 + $0x4] sm:$0x3] }
 0x4df   : > { %5215 = vmatprep.subr.bf16.mxu0 %v6366_v25  ;;  %4507 = vmatprep.subr.mxu1 %v4416_v26 }
 0x4e0   : > { %4569 = vmatprep.mubr.f32.mxu1 %v5379_v34 }
 0x4e1   : > { %4055 = vmatmul.mubr.f32.vlgmr.msra.gmra.mrb[4].mxu0 %v6210_v35 }
 0x4e2   : > { %5217 = vmatpush1.bf16.msra.mxu0 %v6370_v45  ;;  %4510 = vmatpush1.msra.mxu1 %v6430_v52 }
 0x4e3   : > { %4070 = vmatprep.subr.mxu0 %v6415_v37  ;;  %5239 = vmatprep.subr.bf16.mxu1 %v6392_v62 }
 0x4e4   : > { %4131 = vmatprep.mubr.f32.mxu0 %v5379_v34 }
 0x4e5   : > { %4572 = vmatmul.mubr.f32.vlgmr.msra.gmra.mrb[4].mxu1 %v6210_v35  ;;  %v5242_v35 = vpack.c.bf16 %v4405_v32, %v4393_v36 }
 0x4e6   : > { %4072 = vmatpush1.msra.mxu0 %v6373_v56  ;;  %5241 = vmatpush1.bf16.msra.mxu1 %v6402_v33 }
 0x4e7   : > { %5219 = vmatprep.subr.bf16.mxu0 %v5218_v22  ;;  %4587 = vmatprep.subr.mxu1 %v6438_v13 }
 0x4e8   : > { %4648 = vmatprep.mubr.f32.mxu1 %v5379_v34 }
 0x4e9   : > { %4135 = vmatmul.mubr.f32.vlgmr.msra.gmra.mrb[4].mxu0 %v6228_v14 }
 0x4ea   : > { %5221 = vmatpush1.bf16.msra.mxu0 %v5220_v53  ;;  %4589 = vmatpush1.msra.mxu1 %v6417_v38 }
 0x4eb   : > { %4160 = vmatprep.subr.mxu0 %v3900_v59  ;;  %5243 = vmatprep.subr.bf16.mxu1 %v5242_v35  ;;  %v4907_v35 = vld [vmem:[%s5430_s23 + $0x4] sm:$0xff] }
 0x4ec   : > { %4223 = vmatprep.mubr.f32.mxu0 %v5379_v34 }
 0x4ed   : > { %4652 = vmatmul.mubr.f32.vlgmr.msra.gmra.mrb[4].mxu1 %v6228_v14 }
 0x4ee   : > { %4164 = vmatpush1.msra.mxu0 %v3906_v12  ;;  %5245 = vmatpush1.bf16.msra.mxu1 %v5244_v50  ;;  %v4911_v50 = vcombine.high %v4907_v35, %v4907_v35 }
 0x4ef   : > { %5223 = vmatprep.subr.bf16.mxu0 %v6366_v25  ;;  %4677 = vmatprep.subr.mxu1 %v4417_v51 }
 0x4f0   : > { %4740 = vmatprep.mubr.f32.mxu1 %v5379_v34 }
 0x4f1   : > { %4225 = vmatmul.mubr.f32.vlgmr.msra.gmra.mrb[4].mxu0 %v6201_v54 }
 0x4f2   : > { %5225 = vmatpush1.bf16.msra.mxu0 %v6370_v45  ;;  %4681 = vmatpush1.msra.mxu1 %v4423_v40 }
 0x4f3   : > { %4240 = vmatprep.subr.mxu0 %v6415_v37  ;;  %5247 = vmatprep.subr.bf16.mxu1 %v6392_v62 }
 0x4f4   : > { %4301 = vmatprep.mubr.f32.mxu0 %v5379_v34 }
 0x4f5   : > { %4742 = vmatmul.mubr.f32.vlgmr.msra.gmra.mrb[4].mxu1 %v6201_v54 }
 0x4f6   : > { %4242 = vmatpush1.msra.mxu0 %v6373_v56  ;;  %5249 = vmatpush1.bf16.msra.mxu1 %v6402_v33 }
 0x4f7   : > { %4757 = vmatprep.subr.mxu1 %v6438_v13  ;;  %4818 = vmatprep.mubr.f32.mxu1 %v5379_v34 }
 0x4f9   : > { %4303 = vmatmul.mubr.f32.vlgmr.msra.gmra.mrb[4].mxu0 %v6201_v54 }
 0x4fa   : > { %4759 = vmatpush1.msra.mxu1 %v6417_v38 }
 0x4fd   : > { %4820 = vmatmul.mubr.f32.vlgmr.msra.gmra.mrb[4].mxu1 %v6201_v54 }
 0x5a0   : > { %v3787_v14 = vpop.f32.mrb[2].mxu1 }
 0x5a1   : > { %v4830_v41 = vmul.f32 %v3787_v14, %v5967_v16  ;;  %v3789_v29 = vpop.f32.mrb[3].mxu1 }
 0x5a2   : > { %v4831_v63 = vmul.f32 %v3789_v29, %v5969_v46 }
 0x5a3   : > { %v4836_v2 = vsel %vm908_vm9, %v4830_v41, 0.0  ;;  %v4925_v41 = vrot.slane %v4911_v50, %v5425_v5 }
 0x5a4   : > { %v4837_v31 = vsel %vm908_vm9, %v4831_v63, 0.0 }
 0x5a5   : > { %v4838_v4 = vadd.f32 %v4837_v31, %v4836_v2  ;;  %v4927_v2 = vcombine.high %v4925_v41, %v4925_v41 }
 0x5cc   : > { %v4304_v48 = vpop.f32.mrb[4].mxu0 }
 0x5cd   : > { %v4832_v34 = vmul.f32 %v4304_v48, %v5977_v57  ;;  %v4306_v25 = vpop.f32.mrb[5].mxu0 }
 0x5ce   : > { %v4833_v9 = vmul.f32 %v4306_v25, %v5980_v28 }
 0x5cf   : > { %v4839_v45 = vsel %vm908_vm9, %v4832_v34, 0.0 }
 0x5d0   : > { %v4840_v54 = vadd.f32 %v4839_v45, %v4838_v4  ;;  %v4841_v56 = vsel %vm908_vm9, %v4833_v9, 0.0  ;;  %v4821_v27 = vpop.f32.mrb[4].mxu1 }
 0x5d1   : > { %v4834_v32 = vmul.f32 %v4821_v27, %v5984_v55  ;;  %v4823_v0 = vpop.f32.mrb[5].mxu1 }
 0x5d2   : > { %v4842_v19 = vadd.f32 %v4841_v56, %v4840_v54  ;;  %v4835_v61 = vmul.f32 %v4823_v0, %v5987_v20 }
 0x5d3   : > { %v4843_v62 = vsel %vm908_vm9, %v4834_v32, 0.0 }
 0x5d4   : > { %v4844_v43 = vadd.f32 %v4843_v62, %v4842_v19  ;;  %v4845_v21 = vsel %vm908_vm9, %v4835_v61, 0.0 }
 0x5d6   : > { %v4846_v33 = vadd.f32 %v4845_v21, %v4844_v43 }
 0x5d8   : > { %4847 = vadd.xlane.f32.xlu0 %v4846_v33 }
 0x665   : > { %v4848_v36 = vpop.xlane.xlu0 %4847 }
 0x666   : > { %v4849_v37 = vmul.f32 0.001953125, %v4848_v36 }
 0x668   : > { %v4850_v38 = vsub.f32 %v3787_v14, %v4849_v37  ;;  %v4851_v12 = vsub.f32 %v3789_v29, %v4849_v37  ;;  %v4852_v52 = vsub.f32 %v4304_v48, %v4849_v37  ;;  %v4853_v6 = vsub.f32 %v4306_v25, %v4849_v37  ;;  %v5101_v29 = vld.sshfl [vmem:[%s5430_s23 + $0xc] sm:$0x33 pattern:$0x76325410] }
 0x669   : > { %v4854_v15 = vsub.f32 %v4821_v27, %v4849_v37  ;;  %v4855_v39 = vsub.f32 %v4823_v0, %v4849_v37  ;;  %v4918_v14 = vrot.slane %v4907_v35, %v5425_v5  ;;  %v4935_v45 = vcombine.high %v5101_v29, %v5101_v29 }
 0x66a   : > { %v4856_v60 = vmul.f32 %v4850_v38, %v5967_v16  ;;  %v4857_v47 = vmul.f32 %v4851_v12, %v5969_v46  ;;  %v4858_v13 = vmul.f32 %v4852_v52, %v5977_v57  ;;  %v4859_v59 = vmul.f32 %v4853_v6, %v5980_v28 }
 0x66b   : > { %v4860_v1 = vmul.f32 %v4854_v15, %v5984_v55  ;;  %v4861_v30 = vmul.f32 %v4855_v39, %v5987_v20  ;;  %v4926_v63 = vcombine.high %v4918_v14, %v4918_v14 }
 0x66c   : > { %v4862_v58 = vmul.f32 %v4856_v60, %v4856_v60  ;;  %v4863_v7 = vmul.f32 %v4857_v47, %v4857_v47  ;;  %v4864_v40 = vmul.f32 %v4858_v13, %v4858_v13  ;;  %v4865_v26 = vmul.f32 %v4859_v59, %v4859_v59 }
 0x66d   : > { %v4866_v51 = vmul.f32 %v4860_v1, %v4860_v1  ;;  %v4867_v28 = vmul.f32 %v4861_v30, %v4861_v30 }
 0x66e   : > { %v4868_v24 = vsel %vm908_vm9, %v4862_v58, 0.0  ;;  %v4869_v18 = vsel %vm908_vm9, %v4863_v7, 0.0  ;;  %v4871_v46 = vsel %vm908_vm9, %v4864_v40, 0.0  ;;  %v4873_v55 = vsel %vm908_vm9, %v4865_v26, 0.0 }
 0x66f   : > { %v4870_v16 = vadd.f32 %v4869_v18, %v4868_v24  ;;  %v4875_v8 = vsel %vm908_vm9, %v4866_v51, 0.0  ;;  %v4877_v17 = vsel %vm908_vm9, %v4867_v28, 0.0 }
 0x671   : > { %v4872_v57 = vadd.f32 %v4871_v46, %v4870_v16 }
 0x673   : > { %v4874_v44 = vadd.f32 %v4873_v55, %v4872_v57 }
 0x675   : > { %v4876_v20 = vadd.f32 %v4875_v8, %v4874_v44 }
 0x677   : > { %v4878_v3 = vadd.f32 %v4877_v17, %v4876_v20 }
 0x679   : > { %4879 = vadd.xlane.f32.xlu1 %v4878_v3 }
 0x68a   : > { %4898 = vperm.xlu1 %5332, %v5100_v23  }
 0x706   : > { %v4880_v10 = vpop.xlane.xlu1 %4879 }
 0x707   : > { %v4881_v42 = vmul.f32 0.001953125, %v4880_v10 }
 0x709   : > { %v4882_v49 = vadd.f32 1e-05, %v4881_v42 }
 0x70a   : > { %v4899_v9 = vpop.permute.xlu1 %4898 }
 0x70b   : > { %5358 = vrsqrt.f32 %v4882_v49 }
 0x715   : > { %v5359_v22 = vpop.eup %5358 }
 0x716   : > { %v4884_v53 = vmul.f32 %v5359_v22, %v5099_v11 }
 0x718   : > { %4887 = vperm.xlu0 %5331, %v4884_v53  }
 0x797   : > { %v4888_v31 = vpop.permute.xlu0 %4887 }
 0x798   : > { %v4890_v4 = vmul.f32 %v4888_v31, %v4850_v38  ;;  %v4891_v48 = vmul.f32 %v4888_v31, %v4851_v12  ;;  %v4892_v34 = vmul.f32 %v4888_v31, %v4852_v52  ;;  %v4893_v25 = vmul.f32 %v4888_v31, %v4853_v6 }
 0x799   : > { %v4894_v54 = vmul.f32 %v4888_v31, %v4854_v15  ;;  %v4895_v56 = vmul.f32 %v4888_v31, %v4855_v39 }
 0x79a   : > { %v4901_v27 = vadd.f32 %v4899_v9, %v4890_v4  ;;  %v4902_v32 = vadd.f32 %v4899_v9, %v4891_v48  ;;  %v4903_v0 = vadd.f32 %v4899_v9, %v4892_v34  ;;  %v4904_v19 = vadd.f32 %v4899_v9, %v4893_v25 }
 0x79b   : > { %v4905_v61 = vadd.f32 %v4899_v9, %v4894_v54  ;;  %v4906_v62 = vadd.f32 %v4899_v9, %v4895_v56 }
 0x79c   : > { %v4942_v43 = vadd.f32 %v4918_v14, %v4901_v27  ;;  %v4943_v21 = vadd.f32 %v4926_v63, %v4902_v32  ;;  %v4944_v33 = vadd.f32 %v4925_v41, %v4903_v0  ;;  %v4945_v36 = vadd.f32 %v4927_v2, %v4904_v19 }
 0x79d   : > { %v4946_v37 = vadd.f32 %v5101_v29, %v4905_v61  ;;  %v4947_v38 = vadd.f32 %v4935_v45, %v4906_v62 }
 0x79e   : > { %v4948_v12 = vmax.f32 %v4942_v43, 0.0  ;;  %v4949_v52 = vmax.f32 %v4943_v21, 0.0  ;;  %v4950_v6 = vmax.f32 %v4944_v33, 0.0  ;;  %v4951_v60 = vmax.f32 %v4945_v36, 0.0 }
 0x79f   : > { %v4952_v47 = vmax.f32 %v4946_v37, 0.0  ;;  %v4953_v15 = vmax.f32 %v4947_v38, 0.0 }
 0x7a0   : > { %v4960_v39 = vcombine.low %v4948_v12, %v4949_v52  ;;  %v4961_v13 = vcombine.low %v4950_v6, %v4951_v60 }
 0x7a1   : > { %v4977_v59 = vcombine.low %v4952_v47, %v4953_v15 }
 0x7a2   : > { %v4968_v1 = vrot.slane %v4960_v39, %v5425_v5  ;;  %v4975_v58 = vrot.slane %v4961_v13, %v5425_v5 }
 0x7a3   : > { %5102 = vst.sshfl [vmem:[%s278_s25 + $0x8] sm:$0x33 pattern:$0x76325410] %v4977_v59 }
 0x7a4   : > { %v4976_v7 = vcombine.low %v4968_v1, %v4975_v58 }
 0x7a6   : > { %4987 = vst [vmem:[%s278_s25] sm:$0xff] %v4976_v7 }
 0x7a7 PF: > { %s15_s18 = sadd.s32 1, %s5368_s18  }
 0x7a8   : > { %p12_p4 = scmp.ge.s32.totalorder %s15_s18, 4  }
 0x7aa   :  { %14 = sbr.rel (!%p12_p4) target bundleno = 1 (0x1), region = 82 }

</bundles_post_ra>
